<compile_context>
chip_gen: v7x
topology: tpu7x:2x2x1
jax: 0.10.0
libtpu: 0.0.40
codegen_flags: <defaults>
</compile_context>

<pallas_src>
import functools

import jax
import jax.numpy as jnp
from jax import lax
from jax.experimental import pallas as pl
from jax.experimental.pallas import tpu as pltpu


def _round_up(v, m):
    return ((v + m - 1) // m) * m


def _inv_residual_kernel(*refs, stride, dilation, expand, use_res, col_off):
    """1x1 conv -> BN -> ReLU6 -> 3x3 depthwise -> BN -> ReLU6 -> 1x1 conv
    -> BN (+ residual).  BN scales are pre-folded into the weights; only the
    per-channel shifts (b*) are applied in-kernel.  The two 1x1 convs run in
    bf16 on the MXU with f32 accumulation."""
    if expand:
        (x_ref, w1_ref, b1_ref, wdw_ref, b2_ref, w3_ref, b3_ref,
         out_ref, pad_ref) = refs
    else:
        (x_ref, wdw_ref, b2_ref, w3_ref, b3_ref, out_ref, pad_ref) = refs

    Nb, H, W, cin = x_ref.shape
    hidden = wdw_ref.shape[2]
    oup = w3_ref.shape[1]
    H_out, W_out = out_ref.shape[1], out_ref.shape[2]
    d = dilation

    # ---- 1x1 expansion conv (bf16 MXU, f32 acc) + BN shift + ReLU6 ---------
    if expand:
        xin = x_ref[...]                                  # (Nb, H, W, cin) bf16
        h = jnp.dot(xin.reshape(Nb * H * W, cin), w1_ref[...],
                    preferred_element_type=jnp.float32)
        h = jnp.clip(h + b1_ref[...], 0.0, 6.0)
        h = h.reshape(Nb, H, W, hidden)
    else:
        h = x_ref[...].astype(jnp.float32)                # hidden == cin

    # ---- zero-padded halo scratch for the depthwise conv -------------------
    # Only the thin halo frame is zeroed each step; the interior write starts
    # on an 8-aligned sublane (col_off % 8 == 0) -> aligned, unmasked stores.
    Hp = H + 2 * d
    c_lo = col_off - d
    c_hi = col_off + W + d
    zrow = jnp.zeros((Nb, d, c_hi - c_lo, hidden), jnp.float32)
    pad_ref[:, 0:d, c_lo:c_hi, :] = zrow
    pad_ref[:, d + H:Hp, c_lo:c_hi, :] = zrow
    zcol = jnp.zeros((Nb, H, d, hidden), jnp.float32)
    pad_ref[:, d:d + H, c_lo:col_off, :] = zcol
    pad_ref[:, d:d + H, col_off + W:c_hi, :] = zcol
    pad_ref[:, d:d + H, col_off:col_off + W, :] = h

    # ---- 3x3 depthwise conv (f32 VPU) + BN shift + ReLU6 -------------------
    w_dw = wdw_ref[...]                                   # (3, 3, hidden), hoisted

    def tap(kh, kw):
        # Static ref slice: Mosaic folds the offset into the vld base address.
        r0 = kh * d
        c0 = col_off + (kw - 1) * d
        t = pad_ref[:, r0:r0 + H, c0:c0 + W, :]
        if stride != 1:
            # Subsample each tap so accumulation runs at output resolution.
            t = lax.slice(t, (0, 0, 0, 0),
                          (Nb, (H_out - 1) * stride + 1,
                           (W_out - 1) * stride + 1, hidden),
                          (1, stride, stride, 1))
        return t

    # Three independent partial accumulators (one per kernel row) -> VALU ILP.
    parts = []
    for kh in range(3):
        p = tap(kh, 0) * w_dw[kh, 0]
        p = p + tap(kh, 1) * w_dw[kh, 1]
        p = p + tap(kh, 2) * w_dw[kh, 2]
        parts.append(p)
    acc = (parts[0] + parts[1]) + parts[2]
    acc = jnp.clip(acc + b2_ref[...].reshape(1, 1, 1, hidden), 0.0, 6.0)

    # ---- 1x1 projection conv (bf16 MXU, f32 acc) + BN shift ----------------
    y = jnp.dot(acc.reshape(Nb * H_out * W_out, hidden).astype(jnp.bfloat16),
                w3_ref[...], preferred_element_type=jnp.float32)
    y = (y + b3_ref[...]).reshape(Nb, H_out, W_out, oup)

    if use_res:
        # Re-read x here rather than keeping it live across the whole kernel.
        y = y + x_ref[...].astype(jnp.float32)

    out_ref[...] = y.astype(out_ref.dtype)


def inverted_residual(x_nchw, params, *, stride, dilation, expand_ratio):
    """NCHW in / NCHW out (matches the PyTorch module).  Folds BN scales into
    the conv weights, casts matmul operands to bf16 and dispatches the Pallas
    kernel in an NHWC working layout with unpadded channel dims."""
    assert stride in (1, 2)
    N, inp, H, W = x_nchw.shape
    hidden = params["wdw"].shape[2]
    oup = params["w3"].shape[1]
    expand = (expand_ratio != 1)
    if not expand:
        assert hidden == inp, "expand_ratio==1 path requires hidden_dim == inp"
    use_res = (stride == 1) and (inp == oup)

    d = dilation
    col_off = _round_up(d, 8)          # interior starts on an 8-aligned sublane
    H_out = (H - 1) // stride + 1
    W_out = (W - 1) // stride + 1

    f32, bf16 = jnp.float32, jnp.bfloat16
    # Fold BN scales into the conv weights (constant folding outside the
    # kernel; NOT a runtime pre-scale of activations).  Matmul weights go to
    # bf16 for the MXU; the depthwise weights stay f32 (VPU path).
    wdwf = (params["wdw"] * params["s2"][None, None, :]).astype(f32)
    w3f = (params["w3"] * params["s3"][None, :]).astype(bf16)
    b2 = params["b2"].reshape(1, hidden).astype(f32)
    b3 = params["b3"].reshape(1, oup).astype(f32)

    # NHWC working layout, bf16 activations (half the input DMA, MXU-native).
    # TODO(synk): pad W to a sublane multiple for widths like 14/7 so the
    # HW-flatten reshapes before the matmuls stay relayout-free.
    x = jnp.transpose(x_nchw, (0, 2, 3, 1)).astype(bf16)

    # Batch elements per grid step: grow the matmul M toward ~2048 while
    # keeping >= 2 grid steps so the "parallel" batch axis can still be split
    # across TensorCores on v7x.
    Nb = 1
    for cand in range(1, N + 1):
        if N % cand == 0 and cand * H * W <= 2048 and (N == 1 or N // cand >= 2):
            Nb = cand

    inputs = [x]
    in_specs = [pl.BlockSpec((Nb, H, W, inp), lambda n: (n, 0, 0, 0))]

    def rep_spec(shape):
        zeros = (0,) * len(shape)
        return pl.BlockSpec(shape, lambda n, _z=zeros: _z)

    if expand:
        w1f = (params["w1"] * params["s1"][None, :]).astype(bf16)
        b1 = params["b1"].reshape(1, hidden).astype(f32)
        inputs += [w1f, b1]
        in_specs += [rep_spec((inp, hidden)), rep_spec((1, hidden))]
    inputs += [wdwf, b2, w3f, b3]
    in_specs += [rep_spec((3, 3, hidden)), rep_spec((1, hidden)),
                 rep_spec((hidden, oup)), rep_spec((1, oup))]

    # Generation-aware VMEM budget (v7x has 64 MiB vs 128 MiB on v5e/v6e).
    try:
        vmem_cap = int(getattr(pltpu.get_tpu_info(), "vmem_capacity_bytes",
                               64 * 1024 * 1024))
    except Exception:
        vmem_cap = 64 * 1024 * 1024
    vmem_limit = int(min((vmem_cap * 3) // 4, 100 * 1024 * 1024))

    kernel = functools.partial(_inv_residual_kernel,
                               stride=stride, dilation=d, expand=expand,
                               use_res=use_res, col_off=col_off)

    # TODO(synk): for full-resolution MobileNetV2 maps (112x112, hidden>=384)
    # add a spatial (row) tile grid axis with a d-row halo so live f32
    # intermediates stay under v7x's 64 MiB VMEM; whole images fit easily at
    # the shapes exercised here.
    out = pl.pallas_call(
        kernel,
        out_shape=jax.ShapeDtypeStruct((N, H_out, W_out, oup), f32),
        grid_spec=pltpu.PrefetchScalarGridSpec(
            num_scalar_prefetch=0,
            grid=(N // Nb,),
            in_specs=in_specs,
            out_specs=pl.BlockSpec((Nb, H_out, W_out, oup),
                                   lambda n: (n, 0, 0, 0)),
            scratch_shapes=[pltpu.VMEM(
                (Nb, H + 2 * d, col_off + W + d, hidden), f32)],
        ),
        compiler_params=pltpu.CompilerParams(
            dimension_semantics=("parallel",),
            vmem_limit_bytes=vmem_limit),
    )(*inputs)

    return jnp.transpose(out, (0, 3, 1, 2))                # back to NCHW, f32


def init_params(key, inp, oup, expand_ratio):
    """Deterministic synthetic parameters; BN running stats pre-folded into
    per-channel (scale, shift) pairs, matching nn.BatchNorm2d in eval mode."""
    hidden = round(inp * expand_ratio)
    ks = jax.random.split(key, 15)
    eps = 1e-5

    def bn_fold(kg, kb, km, kv, c):
        gamma = 1.0 + 0.1 * jax.random.normal(kg, (c,), jnp.float32)
        beta = 0.1 * jax.random.normal(kb, (c,), jnp.float32)
        mean = 0.1 * jax.random.normal(km, (c,), jnp.float32)
        var = jax.random.uniform(kv, (c,), jnp.float32, minval=0.5, maxval=1.5)
        scale = gamma / jnp.sqrt(var + eps)
        shift = beta - mean * scale
        return scale, shift

    # 1x1 expansion conv weight, stored (inp, hidden) (transposed vs PyTorch).
    w1 = 0.1 * jax.random.normal(ks[0], (inp, hidden), jnp.float32)
    s1, b1 = bn_fold(ks[1], ks[2], ks[3], ks[4], hidden)
    # depthwise 3x3 weight, stored (3, 3, hidden).
    wdw = 0.1 * jax.random.normal(ks[5], (3, 3, hidden), jnp.float32)
    s2, b2 = bn_fold(ks[6], ks[7], ks[8], ks[9], hidden)
    # 1x1 projection conv weight, stored (hidden, oup).
    w3 = 0.1 * jax.random.normal(ks[10], (hidden, oup), jnp.float32)
    s3, b3 = bn_fold(ks[11], ks[12], ks[13], ks[14], oup)

    return dict(w1=w1, s1=s1, b1=b1, wdw=wdw, s2=s2, b2=b2,
                w3=w3, s3=s3, b3=b3)


def _reference(x_nchw, params, *, stride, dilation, expand_ratio):
    """Pure-JAX NCHW reference matching the PyTorch module in eval mode."""
    hidden = params["wdw"].shape[2]
    inp = x_nchw.shape[1]
    oup = params["w3"].shape[1]
    expand = (expand_ratio != 1)
    use_res = (stride == 1) and (inp == oup)

    h = x_nchw
    if expand:
        w1 = params["w1"].T[:, :, None, None]                 # (hidden, inp, 1, 1)
        h = lax.conv_general_dilated(h, w1, (1, 1), "VALID",
                                     dimension_numbers=("NCHW", "OIHW", "NCHW"))
        h = h * params["s1"][None, :, None, None] + params["b1"][None, :, None, None]
        h = jnp.clip(h, 0.0, 6.0)
    wdw = jnp.transpose(params["wdw"], (2, 0, 1))[:, None, :, :]  # (hidden,1,3,3)
    h = lax.conv_general_dilated(
        h, wdw, (stride, stride),
        [(dilation, dilation), (dilation, dilation)],
        rhs_dilation=(dilation, dilation),
        dimension_numbers=("NCHW", "OIHW", "NCHW"),
        feature_group_count=hidden)
    h = h * params["s2"][None, :, None, None] + params["b2"][None, :, None, None]
    h = jnp.clip(h, 0.0, 6.0)
    w3 = params["w3"].T[:, :, None, None]                     # (oup, hidden, 1, 1)
    y = lax.conv_general_dilated(h, w3, (1, 1), "VALID",
                                 dimension_numbers=("NCHW", "OIHW", "NCHW"))
    y = y * params["s3"][None, :, None, None] + params["b3"][None, :, None, None]
    if use_res:
        y = y + x_nchw
    return y


if __name__ == "__main__":
    key = jax.random.PRNGKey(0)

    # (N, inp, oup, H, W, stride, dilation, expand_ratio)
    configs = [
        (2, 4, 4, 16, 16, 1, 1, 6),    # InvResidualExpand path + residual
        (2, 8, 16, 16, 16, 1, 2, 1),   # InvResidualCommon path, dilation=2
    ]
    for (N, inp, oup, H, W, stride, dilation, expand_ratio) in configs:
        kx, kp, key = jax.random.split(key, 3)
        x = jax.random.normal(kx, (N, inp, H, W), jnp.float32)
        params = init_params(kp, inp, oup, expand_ratio)

        out = inverted_residual(x, params, stride=stride, dilation=dilation,
                                expand_ratio=expand_ratio)
        out = jax.block_until_ready(out)
        H_out = (H - 1) // stride + 1
        W_out = (W - 1) // stride + 1
        assert out.shape == (N, oup, H_out, W_out)

        ref = _reference(x, params, stride=stride, dilation=dilation,
                         expand_ratio=expand_ratio)
        max_err = float(jnp.max(jnp.abs(out - ref)))
        # bf16 MXU matmuls -> slightly looser tolerance than pure f32.
        assert jnp.allclose(out, ref, rtol=2e-2, atol=2e-2), max_err

    print("KERNEL_OK")
</pallas_src>

<mosaic_0001>
module attributes {stable_mosaic.version = 11 : i64} {
  func.func @_inv_residual_kernel(%arg0: i32, %arg1: memref<1x16x16x4xbf16, #tpu.memory_space<vmem>>, %arg2: memref<4x24xbf16, #tpu.memory_space<vmem>>, %arg3: memref<1x24xf32, #tpu.memory_space<vmem>>, %arg4: memref<3x3x24xf32, #tpu.memory_space<vmem>>, %arg5: memref<1x24xf32, #tpu.memory_space<vmem>>, %arg6: memref<24x4xbf16, #tpu.memory_space<vmem>>, %arg7: memref<1x4xf32, #tpu.memory_space<vmem>>, %arg8: memref<1x16x16x4xf32, #tpu.memory_space<vmem>>, %arg9: memref<1x18x25x24xf32, #tpu.memory_space<vmem>>) attributes {dimension_semantics = [#tpu.dimension_semantics<parallel>], iteration_bounds = array<i64: 2>, scalar_prefetch = 0 : i64, scratch_operands = 1 : i64, tpu.core_type = #tpu.core_type<tc>, window_params = [{transform_indices = @transform_0, window_bounds = array<i64: 1, 16, 16, 4>}, {pipeline_mode = #tpu.pipeline_mode<synchronous>, transform_indices = @transform_1, window_bounds = array<i64: 4, 24>}, {pipeline_mode = #tpu.pipeline_mode<synchronous>, transform_indices = @transform_2, window_bounds = array<i64: 1, 24>}, {pipeline_mode = #tpu.pipeline_mode<synchronous>, transform_indices = @transform_3, window_bounds = array<i64: 3, 3, 24>}, {pipeline_mode = #tpu.pipeline_mode<synchronous>, transform_indices = @transform_4, window_bounds = array<i64: 1, 24>}, {pipeline_mode = #tpu.pipeline_mode<synchronous>, transform_indices = @transform_5, window_bounds = array<i64: 24, 4>}, {pipeline_mode = #tpu.pipeline_mode<synchronous>, transform_indices = @transform_6, window_bounds = array<i64: 1, 4>}, {transform_indices = @transform_7, window_bounds = array<i64: 1, 16, 16, 4>}]} {
    %c0 = arith.constant 0 : index
    %c0_0 = arith.constant 0 : index
    %c0_1 = arith.constant 0 : index
    %c0_2 = arith.constant 0 : index
    %0 = vector.load %arg1[%c0, %c0_0, %c0_1, %c0_2] : memref<1x16x16x4xbf16, #tpu.memory_space<vmem>>, vector<1x16x16x4xbf16>
    %1 = vector.shape_cast %0 : vector<1x16x16x4xbf16> to vector<256x4xbf16>
    %c0_3 = arith.constant 0 : index
    %c0_4 = arith.constant 0 : index
    %2 = vector.load %arg2[%c0_3, %c0_4] : memref<4x24xbf16, #tpu.memory_space<vmem>>, vector<4x24xbf16>
    %cst = arith.constant dense<0.000000e+00> : vector<256x24xf32>
    %3 = tpu.matmul %1, %2, %cst {dimension_numbers = #tpu.dot_dimension_numbers<[1], [0], [0], [1], [0, 0, 1, 1], [], []>} : vector<256x4xbf16>, vector<4x24xbf16>, vector<256x24xf32> -> vector<256x24xf32>
    %c0_5 = arith.constant 0 : index
    %c0_6 = arith.constant 0 : index
    %4 = vector.load %arg3[%c0_5, %c0_6] : memref<1x24xf32, #tpu.memory_space<vmem>>, vector<1x24xf32>
    %5 = vector.broadcast %4 : vector<1x24xf32> to vector<256x24xf32>
    %6 = arith.addf %3, %5 : vector<256x24xf32>
    %cst_7 = arith.constant 0.000000e+00 : f32
    %cst_8 = arith.constant 6.000000e+00 : f32
    %7 = vector.broadcast %cst_7 : f32 to vector<256x24xf32>
    %8 = arith.maximumf %7, %6 : vector<256x24xf32>
    %9 = vector.broadcast %cst_8 : f32 to vector<256x24xf32>
    %10 = arith.minimumf %9, %8 : vector<256x24xf32>
    %11 = vector.shape_cast %10 : vector<256x24xf32> to vector<1x16x16x24xf32>
    %cst_9 = arith.constant 0.000000e+00 : f32
    %12 = vector.broadcast %cst_9 : f32 to vector<1x1x18x24xf32>
    %c0_10 = arith.constant 0 : index
    %c0_11 = arith.constant 0 : index
    %c7 = arith.constant 7 : index
    %c0_12 = arith.constant 0 : index
    %13 = vector.load %arg9[%c0_10, %c0_11, %c7, %c0_12] : memref<1x18x25x24xf32, #tpu.memory_space<vmem>>, vector<1x1x18x24xf32>
    tpu.vector_store %arg9[%c0_10, %c0_11, %c7, %c0_12], %12 {strides = array<i32>} : memref<1x18x25x24xf32, #tpu.memory_space<vmem>>, vector<1x1x18x24xf32>,
    %c0_13 = arith.constant 0 : index
    %c17 = arith.constant 17 : index
    %c7_14 = arith.constant 7 : index
    %c0_15 = arith.constant 0 : index
    %14 = vector.load %arg9[%c0_13, %c17, %c7_14, %c0_15] : memref<1x18x25x24xf32, #tpu.memory_space<vmem>>, vector<1x1x18x24xf32>
    tpu.vector_store %arg9[%c0_13, %c17, %c7_14, %c0_15], %12 {strides = array<i32>} : memref<1x18x25x24xf32, #tpu.memory_space<vmem>>, vector<1x1x18x24xf32>,
    %cst_16 = arith.constant 0.000000e+00 : f32
    %15 = vector.broadcast %cst_16 : f32 to vector<1x16x1x24xf32>
    %c0_17 = arith.constant 0 : index
    %c1 = arith.constant 1 : index
    %c7_18 = arith.constant 7 : index
    %c0_19 = arith.constant 0 : index
    %16 = vector.load %arg9[%c0_17, %c1, %c7_18, %c0_19] : memref<1x18x25x24xf32, #tpu.memory_space<vmem>>, vector<1x16x1x24xf32>
    tpu.vector_store %arg9[%c0_17, %c1, %c7_18, %c0_19], %15 {strides = array<i32>} : memref<1x18x25x24xf32, #tpu.memory_space<vmem>>, vector<1x16x1x24xf32>,
    %c0_20 = arith.constant 0 : index
    %c1_21 = arith.constant 1 : index
    %c24 = arith.constant 24 : index
    %c0_22 = arith.constant 0 : index
    %17 = vector.load %arg9[%c0_20, %c1_21, %c24, %c0_22] : memref<1x18x25x24xf32, #tpu.memory_space<vmem>>, vector<1x16x1x24xf32>
    tpu.vector_store %arg9[%c0_20, %c1_21, %c24, %c0_22], %15 {strides = array<i32>} : memref<1x18x25x24xf32, #tpu.memory_space<vmem>>, vector<1x16x1x24xf32>,
    %c0_23 = arith.constant 0 : index
    %c1_24 = arith.constant 1 : index
    %c8 = arith.constant 8 : index
    %c0_25 = arith.constant 0 : index
    %18 = vector.load %arg9[%c0_23, %c1_24, %c8, %c0_25] : memref<1x18x25x24xf32, #tpu.memory_space<vmem>>, vector<1x16x16x24xf32>
    tpu.vector_store %arg9[%c0_23, %c1_24, %c8, %c0_25], %11 {strides = array<i32>} : memref<1x18x25x24xf32, #tpu.memory_space<vmem>>, vector<1x16x16x24xf32>,
    %c0_26 = arith.constant 0 : index
    %c0_27 = arith.constant 0 : index
    %c0_28 = arith.constant 0 : index
    %19 = vector.load %arg4[%c0_26, %c0_27, %c0_28] : memref<3x3x24xf32, #tpu.memory_space<vmem>>, vector<3x3x24xf32>
    %c0_29 = arith.constant 0 : index
    %c0_30 = arith.constant 0 : index
    %c7_31 = arith.constant 7 : index
    %c0_32 = arith.constant 0 : index
    %20 = vector.load %arg9[%c0_29, %c0_30, %c7_31, %c0_32] : memref<1x18x25x24xf32, #tpu.memory_space<vmem>>, vector<1x16x16x24xf32>
    %21 = vector.extract_strided_slice %19 {offsets = [0, 0, 0], sizes = [1, 1, 24], strides = [1, 1, 1]} : vector<3x3x24xf32> to vector<1x1x24xf32>
    %22 = vector.shape_cast %21 : vector<1x1x24xf32> to vector<24xf32>
    %23 = vector.shape_cast %22 : vector<24xf32> to vector<1x1x1x24xf32>
    %24 = vector.broadcast %23 : vector<1x1x1x24xf32> to vector<1x16x16x24xf32>
    %25 = arith.mulf %20, %24 : vector<1x16x16x24xf32>
    %c0_33 = arith.constant 0 : index
    %c0_34 = arith.constant 0 : index
    %c8_35 = arith.constant 8 : index
    %c0_36 = arith.constant 0 : index
    %26 = vector.load %arg9[%c0_33, %c0_34, %c8_35, %c0_36] : memref<1x18x25x24xf32, #tpu.memory_space<vmem>>, vector<1x16x16x24xf32>
    %27 = vector.extract_strided_slice %19 {offsets = [0, 1, 0], sizes = [1, 1, 24], strides = [1, 1, 1]} : vector<3x3x24xf32> to vector<1x1x24xf32>
    %28 = vector.shape_cast %27 : vector<1x1x24xf32> to vector<24xf32>
    %29 = vector.shape_cast %28 : vector<24xf32> to vector<1x1x1x24xf32>
    %30 = vector.broadcast %29 : vector<1x1x1x24xf32> to vector<1x16x16x24xf32>
    %31 = arith.mulf %26, %30 : vector<1x16x16x24xf32>
    %32 = arith.addf %25, %31 : vector<1x16x16x24xf32>
    %c0_37 = arith.constant 0 : index
    %c0_38 = arith.constant 0 : index
    %c9 = arith.constant 9 : index
    %c0_39 = arith.constant 0 : index
    %33 = vector.load %arg9[%c0_37, %c0_38, %c9, %c0_39] : memref<1x18x25x24xf32, #tpu.memory_space<vmem>>, vector<1x16x16x24xf32>
    %34 = vector.extract_strided_slice %19 {offsets = [0, 2, 0], sizes = [1, 1, 24], strides = [1, 1, 1]} : vector<3x3x24xf32> to vector<1x1x24xf32>
    %35 = vector.shape_cast %34 : vector<1x1x24xf32> to vector<24xf32>
    %36 = vector.shape_cast %35 : vector<24xf32> to vector<1x1x1x24xf32>
    %37 = vector.broadcast %36 : vector<1x1x1x24xf32> to vector<1x16x16x24xf32>
    %38 = arith.mulf %33, %37 : vector<1x16x16x24xf32>
    %39 = arith.addf %32, %38 : vector<1x16x16x24xf32>
    %c0_40 = arith.constant 0 : index
    %c1_41 = arith.constant 1 : index
    %c7_42 = arith.constant 7 : index
    %c0_43 = arith.constant 0 : index
    %40 = vector.load %arg9[%c0_40, %c1_41, %c7_42, %c0_43] : memref<1x18x25x24xf32, #tpu.memory_space<vmem>>, vector<1x16x16x24xf32>
    %41 = vector.extract_strided_slice %19 {offsets = [1, 0, 0], sizes = [1, 1, 24], strides = [1, 1, 1]} : vector<3x3x24xf32> to vector<1x1x24xf32>
    %42 = vector.shape_cast %41 : vector<1x1x24xf32> to vector<24xf32>
    %43 = vector.shape_cast %42 : vector<24xf32> to vector<1x1x1x24xf32>
    %44 = vector.broadcast %43 : vector<1x1x1x24xf32> to vector<1x16x16x24xf32>
    %45 = arith.mulf %40, %44 : vector<1x16x16x24xf32>
    %c0_44 = arith.constant 0 : index
    %c1_45 = arith.constant 1 : index
    %c8_46 = arith.constant 8 : index
    %c0_47 = arith.constant 0 : index
    %46 = vector.load %arg9[%c0_44, %c1_45, %c8_46, %c0_47] : memref<1x18x25x24xf32, #tpu.memory_space<vmem>>, vector<1x16x16x24xf32>
    %47 = vector.extract_strided_slice %19 {offsets = [1, 1, 0], sizes = [1, 1, 24], strides = [1, 1, 1]} : vector<3x3x24xf32> to vector<1x1x24xf32>
    %48 = vector.shape_cast %47 : vector<1x1x24xf32> to vector<24xf32>
    %49 = vector.shape_cast %48 : vector<24xf32> to vector<1x1x1x24xf32>
    %50 = vector.broadcast %49 : vector<1x1x1x24xf32> to vector<1x16x16x24xf32>
    %51 = arith.mulf %46, %50 : vector<1x16x16x24xf32>
    %52 = arith.addf %45, %51 : vector<1x16x16x24xf32>
    %c0_48 = arith.constant 0 : index
    %c1_49 = arith.constant 1 : index
    %c9_50 = arith.constant 9 : index
    %c0_51 = arith.constant 0 : index
    %53 = vector.load %arg9[%c0_48, %c1_49, %c9_50, %c0_51] : memref<1x18x25x24xf32, #tpu.memory_space<vmem>>, vector<1x16x16x24xf32>
    %54 = vector.extract_strided_slice %19 {offsets = [1, 2, 0], sizes = [1, 1, 24], strides = [1, 1, 1]} : vector<3x3x24xf32> to vector<1x1x24xf32>
    %55 = vector.shape_cast %54 : vector<1x1x24xf32> to vector<24xf32>
    %56 = vector.shape_cast %55 : vector<24xf32> to vector<1x1x1x24xf32>
    %57 = vector.broadcast %56 : vector<1x1x1x24xf32> to vector<1x16x16x24xf32>
    %58 = arith.mulf %53, %57 : vector<1x16x16x24xf32>
    %59 = arith.addf %52, %58 : vector<1x16x16x24xf32>
    %c0_52 = arith.constant 0 : index
    %c2 = arith.constant 2 : index
    %c7_53 = arith.constant 7 : index
    %c0_54 = arith.constant 0 : index
    %60 = vector.load %arg9[%c0_52, %c2, %c7_53, %c0_54] : memref<1x18x25x24xf32, #tpu.memory_space<vmem>>, vector<1x16x16x24xf32>
    %61 = vector.extract_strided_slice %19 {offsets = [2, 0, 0], sizes = [1, 1, 24], strides = [1, 1, 1]} : vector<3x3x24xf32> to vector<1x1x24xf32>
    %62 = vector.shape_cast %61 : vector<1x1x24xf32> to vector<24xf32>
    %63 = vector.shape_cast %62 : vector<24xf32> to vector<1x1x1x24xf32>
    %64 = vector.broadcast %63 : vector<1x1x1x24xf32> to vector<1x16x16x24xf32>
    %65 = arith.mulf %60, %64 : vector<1x16x16x24xf32>
    %c0_55 = arith.constant 0 : index
    %c2_56 = arith.constant 2 : index
    %c8_57 = arith.constant 8 : index
    %c0_58 = arith.constant 0 : index
    %66 = vector.load %arg9[%c0_55, %c2_56, %c8_57, %c0_58] : memref<1x18x25x24xf32, #tpu.memory_space<vmem>>, vector<1x16x16x24xf32>
    %67 = vector.extract_strided_slice %19 {offsets = [2, 1, 0], sizes = [1, 1, 24], strides = [1, 1, 1]} : vector<3x3x24xf32> to vector<1x1x24xf32>
    %68 = vector.shape_cast %67 : vector<1x1x24xf32> to vector<24xf32>
    %69 = vector.shape_cast %68 : vector<24xf32> to vector<1x1x1x24xf32>
    %70 = vector.broadcast %69 : vector<1x1x1x24xf32> to vector<1x16x16x24xf32>
    %71 = arith.mulf %66, %70 : vector<1x16x16x24xf32>
    %72 = arith.addf %65, %71 : vector<1x16x16x24xf32>
    %c0_59 = arith.constant 0 : index
    %c2_60 = arith.constant 2 : index
    %c9_61 = arith.constant 9 : index
    %c0_62 = arith.constant 0 : index
    %73 = vector.load %arg9[%c0_59, %c2_60, %c9_61, %c0_62] : memref<1x18x25x24xf32, #tpu.memory_space<vmem>>, vector<1x16x16x24xf32>
    %74 = vector.extract_strided_slice %19 {offsets = [2, 2, 0], sizes = [1, 1, 24], strides = [1, 1, 1]} : vector<3x3x24xf32> to vector<1x1x24xf32>
    %75 = vector.shape_cast %74 : vector<1x1x24xf32> to vector<24xf32>
    %76 = vector.shape_cast %75 : vector<24xf32> to vector<1x1x1x24xf32>
    %77 = vector.broadcast %76 : vector<1x1x1x24xf32> to vector<1x16x16x24xf32>
    %78 = arith.mulf %73, %77 : vector<1x16x16x24xf32>
    %79 = arith.addf %72, %78 : vector<1x16x16x24xf32>
    %80 = arith.addf %39, %59 : vector<1x16x16x24xf32>
    %81 = arith.addf %80, %79 : vector<1x16x16x24xf32>
    %c0_63 = arith.constant 0 : index
    %c0_64 = arith.constant 0 : index
    %82 = vector.load %arg5[%c0_63, %c0_64] : memref<1x24xf32, #tpu.memory_space<vmem>>, vector<1x24xf32>
    %83 = vector.shape_cast %82 : vector<1x24xf32> to vector<1x1x1x24xf32>
    %84 = vector.broadcast %83 : vector<1x1x1x24xf32> to vector<1x16x16x24xf32>
    %85 = arith.addf %81, %84 : vector<1x16x16x24xf32>
    %cst_65 = arith.constant 0.000000e+00 : f32
    %cst_66 = arith.constant 6.000000e+00 : f32
    %86 = vector.broadcast %cst_65 : f32 to vector<1x16x16x24xf32>
    %87 = arith.maximumf %86, %85 : vector<1x16x16x24xf32>
    %88 = vector.broadcast %cst_66 : f32 to vector<1x16x16x24xf32>
    %89 = arith.minimumf %88, %87 : vector<1x16x16x24xf32>
    %90 = vector.shape_cast %89 : vector<1x16x16x24xf32> to vector<256x24xf32>
    %91 = arith.truncf %90 : vector<256x24xf32> to vector<256x24xbf16>
    %c0_67 = arith.constant 0 : index
    %c0_68 = arith.constant 0 : index
    %92 = vector.load %arg6[%c0_67, %c0_68] : memref<24x4xbf16, #tpu.memory_space<vmem>>, vector<24x4xbf16>
    %cst_69 = arith.constant dense<0.000000e+00> : vector<256x4xf32>
    %93 = tpu.matmul %91, %92, %cst_69 {dimension_numbers = #tpu.dot_dimension_numbers<[1], [0], [0], [1], [0, 0, 1, 1], [], []>} : vector<256x24xbf16>, vector<24x4xbf16>, vector<256x4xf32> -> vector<256x4xf32>
    %c0_70 = arith.constant 0 : index
    %c0_71 = arith.constant 0 : index
    %94 = vector.load %arg7[%c0_70, %c0_71] : memref<1x4xf32, #tpu.memory_space<vmem>>, vector<1x4xf32>
    %95 = vector.broadcast %94 : vector<1x4xf32> to vector<256x4xf32>
    %96 = arith.addf %93, %95 : vector<256x4xf32>
    %97 = vector.shape_cast %96 : vector<256x4xf32> to vector<1x16x16x4xf32>
    %c0_72 = arith.constant 0 : index
    %c0_73 = arith.constant 0 : index
    %c0_74 = arith.constant 0 : index
    %c0_75 = arith.constant 0 : index
    %98 = vector.load %arg1[%c0_72, %c0_73, %c0_74, %c0_75] : memref<1x16x16x4xbf16, #tpu.memory_space<vmem>>, vector<1x16x16x4xbf16>
    %99 = arith.extf %98 : vector<1x16x16x4xbf16> to vector<1x16x16x4xf32>
    %100 = arith.addf %97, %99 : vector<1x16x16x4xf32>
    %c0_76 = arith.constant 0 : index
    %c0_77 = arith.constant 0 : index
    %c0_78 = arith.constant 0 : index
    %c0_79 = arith.constant 0 : index
    %101 = vector.load %arg8[%c0_76, %c0_77, %c0_78, %c0_79] : memref<1x16x16x4xf32, #tpu.memory_space<vmem>>, vector<1x16x16x4xf32>
    tpu.vector_store %arg8[%c0_76, %c0_77, %c0_78, %c0_79], %100 {strides = array<i32>} : memref<1x16x16x4xf32, #tpu.memory_space<vmem>>, vector<1x16x16x4xf32>,
    return
  }
  func.func @transform_0(%arg0: i32) -> (i32, i32, i32, i32) {
    %c0_i32 = arith.constant 0 : i32
    %c0_i32_0 = arith.constant 0 : i32
    %c0_i32_1 = arith.constant 0 : i32
    %c0_i32_2 = arith.constant 0 : i32
    return %arg0, %c0_i32, %c0_i32_0, %c0_i32_1 : i32, i32, i32, i32
  }
  func.func @transform_1(%arg0: i32) -> (i32, i32) {
    %c0_i32 = arith.constant 0 : i32
    %c0_i32_0 = arith.constant 0 : i32
    %c0_i32_1 = arith.constant 0 : i32
    return %c0_i32, %c0_i32_0 : i32, i32
  }
  func.func @transform_2(%arg0: i32) -> (i32, i32) {
    %c0_i32 = arith.constant 0 : i32
    %c0_i32_0 = arith.constant 0 : i32
    %c0_i32_1 = arith.constant 0 : i32
    return %c0_i32, %c0_i32_0 : i32, i32
  }
  func.func @transform_3(%arg0: i32) -> (i32, i32, i32) {
    %c0_i32 = arith.constant 0 : i32
    %c0_i32_0 = arith.constant 0 : i32
    %c0_i32_1 = arith.constant 0 : i32
    %c0_i32_2 = arith.constant 0 : i32
    return %c0_i32, %c0_i32_0, %c0_i32_1 : i32, i32, i32
  }
  func.func @transform_4(%arg0: i32) -> (i32, i32) {
    %c0_i32 = arith.constant 0 : i32
    %c0_i32_0 = arith.constant 0 : i32
    %c0_i32_1 = arith.constant 0 : i32
    return %c0_i32, %c0_i32_0 : i32, i32
  }
  func.func @transform_5(%arg0: i32) -> (i32, i32) {
    %c0_i32 = arith.constant 0 : i32
    %c0_i32_0 = arith.constant 0 : i32
    %c0_i32_1 = arith.constant 0 : i32
    return %c0_i32, %c0_i32_0 : i32, i32
  }
  func.func @transform_6(%arg0: i32) -> (i32, i32) {
    %c0_i32 = arith.constant 0 : i32
    %c0_i32_0 = arith.constant 0 : i32
    %c0_i32_1 = arith.constant 0 : i32
    return %c0_i32, %c0_i32_0 : i32, i32
  }
  func.func @transform_7(%arg0: i32) -> (i32, i32, i32, i32) {
    %c0_i32 = arith.constant 0 : i32
    %c0_i32_0 = arith.constant 0 : i32
    %c0_i32_1 = arith.constant 0 : i32
    %c0_i32_2 = arith.constant 0 : i32
    return %arg0, %c0_i32, %c0_i32_0, %c0_i32_1 : i32, i32, i32, i32
  }
}

</mosaic_0001>

<bundles_post_ra>
// kernel: tpu_custom_call.1
= control target key start
LH: loop header
LB: loop body
LE: loop exit
PB: predicated region body
PF: predicated region fallthrough
CT: control target
= control target key end

     0   :  { %s2488_s24 = smov 0   ;;  %s3587_s0 = inlined_call_operand.vmem [shape: bf16[2,16,16,4], index: 0, kind: input, shape index: {}]   ;;  %s3588_s1 = inlined_call_operand.vmem [shape: bf16[4,24], index: 1, kind: input, shape index: {}]   ;;  %s3589_s2 = inlined_call_operand.vmem [shape: f32[1,24], index: 2, kind: input, shape index: {}]   ;;  %s3590_s3 = inlined_call_operand.vmem [shape: f32[3,3,24], index: 3, kind: input, shape index: {}]   ;;  %s3591_s4 = inlined_call_operand.vmem [shape: f32[1,24], index: 4, kind: input, shape index: {}]   ;;  %s3592_s5 = inlined_call_operand.vmem [shape: bf16[24,4], index: 5, kind: input, shape index: {}]   ;;  %s3593_s6 = inlined_call_operand.vmem [shape: f32[1,4], index: 6, kind: input, shape index: {}]   ;;  %s3594_s7 = inlined_call_operand.vmem [shape: f32[2,16,16,4], index: 7, kind: output, shape index: {}]  }
   0x1 LB: > { %s2159_s25 = sadd.s32 4294967295, %s2445_s24   ;;  %p2163_p0 = scmp.ge.s32.totalorder %s2445_s24, 1  ;;  %s2445_s24 = sphi %s2488_s24, %s17_s24  }
   0x2   : > { %p237_p1 = scmp.lt.s32.totalorder %s2445_s24, 3 }
   0x4   : > { %p238_p2 = pnand %p2163_p0, %p237_p1 }
   0x5   : > { %v312_v0 = vld [vmem:[%s3588_s1] sm:$0x3] (!%p238_p2)  ;;  %vm449_vm0 = vcmask (!%p238_p2), 1041408   ;;  %p269_p3 = scmp.lt.s32.totalorder (!%p238_p2), %s2159_s25, 1  ;;  %vm400_vm1 = vcmask (!%p238_p2), 31744   ;;  %vm678_vm2 = vcmask (!%p238_p2), 195584   ;;  %v788_v22 = vlaneseq (!%p238_p2) }
   0x6   : > { %241 = sbr.rel (%p238_p2) target bundleno = 655 (0x28f), region = 48  ;;  %2409 = vmatprep.subr.msk.bf16.mxu0 (!%p238_p2), %vm449_vm0, %v312_v0  ;;  %v451_v1 = vsel (!%p238_p2), %vm449_vm0, %v312_v0, 0  ;;  %vm688_vm3 = vcmask (!%p238_p2), 188416   ;;  %v2447_v18 = vmov (!%p238_p2), 0.0   ;;  %vm681_vm4 = vcmask (!%p238_p2), 189440   ;;  %v2436_v19 = vld [vmem:[%s3592_s5] sm:$0xff] (!%p238_p2)  }
   0x7   : > { %2340 = vmatpush3.bf16.msra.mxu0 (!%p238_p2), %v451_v1  ;;  %679 = vst.msk [vmem:[#allocation2 + $0x7] sm:$0xff] (!%p238_p2), %vm678_vm2, %v2447_v18  ;;  %680 = vst.msk [vmem:[#allocation2 + $0xf] sm:$0xff] (!%p238_p2), %vm678_vm2, %v2447_v18  ;;  %2373 = vmatprep.subr.bf16.mxu1 (!%p238_p2), %v2436_v19  ;;  %v2437_v20 = vld [vmem:[%s3592_s5 + $0x8] ss:$0 sps:$4 sm:$0xff] (!%p238_p2)   ;;  %vm1811_vm5 = vcmask (!%p238_p2), 1043456   ;;  %v789_v23 = vshrl.u32 (!%p238_p2), %v788_v22, 7 }
   0x8   : > { %689 = vst.msk [vmem:[#allocation2 + $0x27] sm:$0x1] (!%p238_p2), %vm688_vm3, %v2447_v18  ;;  %690 = vst.msk [vmem:[#allocation2 + $0x47] sm:$0x1] (!%p238_p2), %vm688_vm3, %v2447_v18  ;;  %2374 = vmatpush3.bf16.msra.mxu1 (!%p238_p2), %v2436_v19  ;;  %v1813_v21 = vsel (!%p238_p2), %vm1811_vm5, %v2437_v20, 0 }
   0x9   : > { %705 = vst.msk [vmem:[#allocation2 + $0x38] sm:$0x1] (!%p238_p2), %vm688_vm3, %v2447_v18  ;;  %706 = vst.msk [vmem:[#allocation2 + $0x58] sm:$0x1] (!%p238_p2), %vm688_vm3, %v2447_v18  ;;  %2410 = vmatprep.subr.msk.bf16.mxu1 (!%p238_p2), %vm1811_vm5, %v2437_v20  ;;  %v790_v24 = vsub.s32 (!%p238_p2), 0, %v789_v23  ;;  %v858_v25 = vsub.s32 (!%p238_p2), 1, %v789_v23 }
   0xa   : > { %684 = vst.msk [vmem:[#allocation2 + $0x227] sm:$0xff] (!%p238_p2), %vm678_vm2, %v2447_v18  ;;  %685 = vst.msk [vmem:[#allocation2 + $0x22f] sm:$0xff] (!%p238_p2), %vm678_vm2, %v2447_v18  ;;  %v2584_v26 = vld [vmem:[%s3589_s2] ss:$0 sm:$0xff] (!%p238_p2)  ;;  %v958_v29 = vsub.s32 (!%p238_p2), 2, %v789_v23 }
   0xb   : > { %691 = vst.msk [vmem:[#allocation2 + $0x67] sm:$0x1] (!%p238_p2), %vm688_vm3, %v2447_v18  ;;  %692 = vst.msk [vmem:[#allocation2 + $0x87] sm:$0x1] (!%p238_p2), %vm688_vm3, %v2447_v18  ;;  %v753_v27 = vld [vmem:[%s3590_s3] sm:$0x7] (!%p238_p2) }
   0xc   : > { %693 = vst.msk [vmem:[#allocation2 + $0xa7] sm:$0x1] (!%p238_p2), %vm688_vm3, %v2447_v18  ;;  %694 = vst.msk [vmem:[#allocation2 + $0xc7] sm:$0x1] (!%p238_p2), %vm688_vm3, %v2447_v18  ;;  %2376 = vmatpush3.bf16.msra.mxu1 (!%p238_p2), %v1813_v21  ;;  %v2590_v32 = vrot.slane (!%p238_p2), %v753_v27, %v790_v24  ;;  %v2592_v33 = vrot.slane (!%p238_p2), %v753_v27, %v858_v25  ;;  %v2597_v45 = vrot.slane (!%p238_p2), %v753_v27, %v958_v29  ;;  %v754_v52 = vld [vmem:[%s3590_s3 + $0x4] sm:$0x7] (!%p238_p2) }
   0xd   : > { %s3596_s25 = smov (!%p269_p3, %s2159_s25), 1  ;;  %695 = vst.msk [vmem:[#allocation2 + $0xe7] sm:$0x1] %vm688_vm3, %v2447_v18  ;;  %696 = vst.msk [vmem:[#allocation2 + $0x107] sm:$0x1] %vm688_vm3, %v2447_v18  ;;  %v2613_v0 = vrot.slane %v754_v52, %v790_v24 }
   0xe   : > { %s2223_s28 = sshll.u32 %s3596_s25, 7  ;;  %697 = vst.msk [vmem:[#allocation2 + $0x127] sm:$0x1] %vm688_vm3, %v2447_v18  ;;  %698 = vst.msk [vmem:[#allocation2 + $0x147] sm:$0x1] %vm688_vm3, %v2447_v18  ;;  %v756_v36 = vld [vmem:[#allocation2 + $0x7] sm:$0xff] }
   0xf   : > { %s2505_s8 = scalar_lea.vmem %s3587_s0, %s2223_s28  ;;  %699 = vst.msk [vmem:[#allocation2 + $0x167] sm:$0x1] %vm688_vm3, %v2447_v18  ;;  %700 = vst.msk [vmem:[#allocation2 + $0x187] sm:$0x1] %vm688_vm3, %v2447_v18  ;;  %v824_v37 = vld [vmem:[#allocation2 + $0x8] sm:$0xff]  ;;  %v792_v48 = vmul.f32 %v2590_v32, %v756_v36  ;;  %s2224_s29 = sshll.u32 %s3596_s25, 8 }
  0x10   : > { %v2420_v2 = vld [vmem:[%s2505_s8] sm:$0xff]   ;;  %v2421_v3 = vld [vmem:[%s2505_s8 + $0x8] sm:$0xff]   ;;  %v2422_v4 = vld [vmem:[%s2505_s8 + $0x10] sm:$0xff]   ;;  %701 = vst.msk [vmem:[#allocation2 + $0x1a7] sm:$0x1] %vm688_vm3, %v2447_v18  ;;  %v860_v49 = vmul.f32 %v2592_v33, %v824_v37  ;;  %s3473_s10 = scalar_lea.vmem %s3594_s7, %s2224_s29 }
  0x11   : > { %2341 = vmatprep.mubr.msk.bf16.mxu0 %vm400_vm1, %v2420_v2  ;;  %v2423_v5 = vld [vmem:[%s2505_s8 + $0x18] sm:$0xff]   ;;  %v2424_v6 = vld [vmem:[%s2505_s8 + $0x20] sm:$0xff]   ;;  %v2425_v7 = vld [vmem:[%s2505_s8 + $0x28] sm:$0xff]   ;;  %702 = vst.msk [vmem:[#allocation2 + $0x1c7] sm:$0x1] %vm688_vm3, %v2447_v18 }
  0x12   : > { %2342 = vmatmul.mubr.msk.bf16.vlgmr.msra.gmra.mrb[0].mxu0 %vm400_vm1, %v2421_v3  ;;  %v2426_v8 = vld [vmem:[%s2505_s8 + $0x30] sm:$0xff]   ;;  %v2427_v9 = vld [vmem:[%s2505_s8 + $0x38] sm:$0xff]   ;;  %v2428_v10 = vld [vmem:[%s2505_s8 + $0x40] sm:$0xff]   ;;  %703 = vst.msk [vmem:[#allocation2 + $0x1e7] sm:$0x1] %vm688_vm3, %v2447_v18  ;;  %v892_v63 = vadd.f32 %v860_v49, %v792_v48 }
  0x13   : > { %2345 = vmatprep.mubr.msk.bf16.mxu0 %vm400_vm1, %v2422_v4  ;;  %v2429_v11 = vld [vmem:[%s2505_s8 + $0x48] sm:$0xff]   ;;  %v2430_v12 = vld [vmem:[%s2505_s8 + $0x50] sm:$0xff]   ;;  %v2431_v13 = vld [vmem:[%s2505_s8 + $0x58] sm:$0xff]   ;;  %704 = vst.msk [vmem:[#allocation2 + $0x207] sm:$0x1] %vm688_vm3, %v2447_v18 }
  0x14   : > { %v2432_v14 = vld [vmem:[%s2505_s8 + $0x60] sm:$0xff]   ;;  %v2433_v15 = vld [vmem:[%s2505_s8 + $0x68] sm:$0xff]   ;;  %v2434_v16 = vld [vmem:[%s2505_s8 + $0x70] sm:$0xff]   ;;  %707 = vst.msk [vmem:[#allocation2 + $0x78] sm:$0x1] %vm688_vm3, %v2447_v18 }
  0x15   : > { %v2435_v17 = vld [vmem:[%s2505_s8 + $0x78] sm:$0xff]   ;;  %708 = vst.msk [vmem:[#allocation2 + $0x98] sm:$0x1] %vm688_vm3, %v2447_v18  ;;  %709 = vst.msk [vmem:[#allocation2 + $0xb8] sm:$0x1] %vm688_vm3, %v2447_v18  ;;  %v757_v41 = vld [vmem:[#allocation2 + $0xf] sm:$0xff] }
  0x16   : > { %710 = vst.msk [vmem:[#allocation2 + $0xd8] sm:$0x1] %vm688_vm3, %v2447_v18  ;;  %711 = vst.msk [vmem:[#allocation2 + $0xf8] sm:$0x1] %vm688_vm3, %v2447_v18  ;;  %v793_v53 = vmul.f32 %v2590_v32, %v757_v41  ;;  %v924_v56 = vld [vmem:[#allocation2 + $0x9] sm:$0xff] }
  0x17   : > { %712 = vst.msk [vmem:[#allocation2 + $0x118] sm:$0x1] %vm688_vm3, %v2447_v18  ;;  %713 = vst.msk [vmem:[#allocation2 + $0x138] sm:$0x1] %vm688_vm3, %v2447_v18  ;;  %v755_v60 = vld [vmem:[%s3590_s3 + $0x8] sm:$0x7]  ;;  %v960_v4 = vmul.f32 %v2597_v45, %v924_v56 }
  0x18   : > { %714 = vst.msk [vmem:[#allocation2 + $0x158] sm:$0x1] %vm688_vm3, %v2447_v18  ;;  %715 = vst.msk [vmem:[#allocation2 + $0x178] sm:$0x1] %vm688_vm3, %v2447_v18 }
  0x19   : > { %716 = vst.msk [vmem:[#allocation2 + $0x198] sm:$0x1] %vm688_vm3, %v2447_v18  ;;  %717 = vst.msk [vmem:[#allocation2 + $0x1b8] sm:$0x1] %vm688_vm3, %v2447_v18  ;;  %v992_v20 = vadd.f32 %v960_v4, %v892_v63 }
  0x1a   : > { %2346 = vmatmul.mubr.msk.bf16.gmra.mrb[4].mxu0 %vm400_vm1, %v2423_v5  ;;  %718 = vst.msk [vmem:[#allocation2 + $0x1d8] sm:$0x1] %vm688_vm3, %v2447_v18  ;;  %719 = vst.msk [vmem:[#allocation2 + $0x1f8] sm:$0x1] %vm688_vm3, %v2447_v18 }
  0x1b   : > { %2349 = vmatprep.mubr.msk.bf16.mxu0 %vm400_vm1, %v2424_v6  ;;  %720 = vst.msk [vmem:[#allocation2 + $0x218] sm:$0x1] %vm688_vm3, %v2447_v18 }
  0x1c   : > { %682 = vst.msk [vmem:[#allocation2 + $0x17] sm:$0x3] %vm681_vm4, %v2447_v18  ;;  %686 = vst.msk [vmem:[#allocation2 + $0x237] sm:$0x3] %vm681_vm4, %v2447_v18 }
  0x22   : > { %2350 = vmatmul.mubr.msk.bf16.gmra.mrb[8].mxu0 %vm400_vm1, %v2425_v7 }
  0x23   : > { %2353 = vmatprep.mubr.msk.bf16.mxu0 %vm400_vm1, %v2426_v8  ;;  %v825_v42 = vld [vmem:[#allocation2 + $0x10] sm:$0xff] }
  0x24   : > { %v861_v54 = vmul.f32 %v2592_v33, %v825_v42  ;;  %v925_v57 = vld [vmem:[#allocation2 + $0x11] sm:$0xff] }
  0x25   : > { %v961_v5 = vmul.f32 %v2597_v45, %v925_v57 }
  0x26   : > { %v893_v3 = vadd.f32 %v861_v54, %v793_v53 }
  0x28   : > { %v993_v21 = vadd.f32 %v961_v5, %v893_v3 }
  0x2a   : > { %2354 = vmatmul.mubr.msk.bf16.gmra.mrb[12].mxu0 %vm400_vm1, %v2427_v9  ;;  %v2620_v9 = vrot.slane %v755_v60, %v790_v24 }
  0x2b   : > { %2357 = vmatprep.mubr.msk.bf16.mxu0 %vm400_vm1, %v2428_v10  ;;  %v2622_v10 = vrot.slane %v755_v60, %v858_v25 }
  0x32   : > { %2358 = vmatmul.mubr.msk.bf16.gmra.mrb[16].mxu0 %vm400_vm1, %v2429_v11 }
  0x33   : > { %2361 = vmatprep.mubr.msk.bf16.mxu0 %vm400_vm1, %v2430_v12 }
  0x3a   : > { %2362 = vmatmul.mubr.msk.bf16.gmra.mrb[20].mxu0 %vm400_vm1, %v2431_v13  ;;  %v2625_v13 = vrot.slane %v754_v52, %v858_v25 }
  0x3b   : > { %2365 = vmatprep.mubr.msk.bf16.mxu0 %vm400_vm1, %v2432_v14 }
  0x42   : > { %2366 = vmatmul.mubr.msk.bf16.gmra.mrb[24].mxu0 %vm400_vm1, %v2433_v15 }
  0x43   : > { %2369 = vmatprep.mubr.msk.bf16.mxu0 %vm400_vm1, %v2434_v16  ;;  %v2627_v16 = vrot.slane %v754_v52, %v958_v29 }
  0x4a   : > { %2370 = vmatmul.mubr.msk.bf16.gmra.mrb[28].mxu0 %vm400_vm1, %v2435_v17  ;;  %v2629_v17 = vrot.slane %v755_v60, %v958_v29 }
  0xe5   : > { %v2343_v28 = vpop.f32.mrb[0].mxu0 }
  0xe6   : > { %v496_v30 = vadd.f32 %v2343_v28, %v2584_v26  ;;  %v487_v31 = vpop.f32.mrb[1].mxu0 }
  0xe7   : > { %v488_v34 = vadd.f32 %v2584_v26, %v487_v31  ;;  %v2344_v35 = vpop.f32.mrb[2].mxu0 }
  0xe8   : > { %v616_v38 = vmax.f32 %v496_v30, 0.0  ;;  %v499_v39 = vadd.f32 %v2344_v35, %v2584_v26  ;;  %v490_v40 = vpop.f32.mrb[3].mxu0 }
  0xe9   : > { %v614_v43 = vmax.f32 %v488_v34, 0.0  ;;  %v491_v44 = vadd.f32 %v2584_v26, %v490_v40 }
  0xea   : > { %v648_v46 = vmin.f32 %v616_v38, 6.0  ;;  %v617_v47 = vmax.f32 %v499_v39, 0.0 }
  0xeb   : > { %v646_v50 = vmin.f32 %v614_v43, 6.0  ;;  %v615_v51 = vmax.f32 %v491_v44, 0.0 }
  0xec   : > { %723 = vst.msk [vmem:[#allocation2 + $0x48] sm:$0xff] %vm678_vm2, %v648_v46  ;;  %v649_v55 = vmin.f32 %v617_v47, 6.0 }
  0xed   : > { %721 = vst.msk [vmem:[#allocation2 + $0x28] sm:$0xff] %vm678_vm2, %v646_v50  ;;  %v647_v58 = vmin.f32 %v615_v51, 6.0  ;;  %v2347_v59 = vpop.f32.mrb[4].mxu0 }
  0xee   : > { %724 = vst.msk [vmem:[#allocation2 + $0x50] sm:$0xff] %vm678_vm2, %v649_v55  ;;  %v512_v61 = vadd.f32 %v2347_v59, %v2584_v26  ;;  %v503_v62 = vpop.f32.mrb[5].mxu0 }
  0xef   : > { %722 = vst.msk [vmem:[#allocation2 + $0x30] sm:$0xff] %vm678_vm2, %v647_v58  ;;  %v504_v1 = vadd.f32 %v2584_v26, %v503_v62  ;;  %v2348_v2 = vpop.f32.mrb[6].mxu0 }
  0xf0   : > { %v620_v6 = vmax.f32 %v512_v61, 0.0  ;;  %v515_v7 = vadd.f32 %v2348_v2, %v2584_v26  ;;  %v506_v8 = vpop.f32.mrb[7].mxu0 }
  0xf1   : > { %v618_v11 = vmax.f32 %v504_v1, 0.0  ;;  %v507_v12 = vadd.f32 %v2584_v26, %v506_v8 }
  0xf2   : > { %v652_v14 = vmin.f32 %v620_v6, 6.0  ;;  %v621_v15 = vmax.f32 %v515_v7, 0.0 }
  0xf3   : > { %v650_v18 = vmin.f32 %v618_v11, 6.0  ;;  %v619_v19 = vmax.f32 %v507_v12, 0.0  ;;  %v2631_v22 = vld [vmem:[#allocation2 + $0x47] sm:$0xff] }
  0xf4   : > { %v2633_v23 = vld [vmem:[#allocation2 + $0x48] sm:$0xff]  ;;  %727 = vst.msk [vmem:[#allocation2 + $0x88] sm:$0xff] %vm678_vm2, %v652_v14  ;;  %v653_v24 = vmin.f32 %v621_v15, 6.0  ;;  %v1329_v28 = vmul.f32 %v2620_v9, %v2631_v22  ;;  %v2642_v30 = vmul.f32 %v2631_v22, %v2613_v0 }
  0xf5   : > { %v1024_v27 = vld [vmem:[#allocation2 + $0x27] sm:$0xff]  ;;  %v1397_v29 = vmul.f32 %v2622_v10, %v2633_v23  ;;  %725 = vst.msk [vmem:[#allocation2 + $0x68] sm:$0xff] %vm678_vm2, %v650_v18  ;;  %v651_v31 = vmin.f32 %v619_v19, 6.0  ;;  %v2351_v34 = vpop.f32.mrb[8].mxu0  ;;  %v2647_v37 = vld [vmem:[#allocation2 + $0x4f] sm:$0xff] }
  0xf6   : > { %v1092_v25 = vld [vmem:[#allocation2 + $0x28] sm:$0xff]  ;;  %v1060_v35 = vmul.f32 %v2613_v0, %v1024_v27  ;;  %v2649_v38 = vld [vmem:[#allocation2 + $0x50] sm:$0xff]  ;;  %v794_v39 = vmul.f32 %v1024_v27, %v2590_v32  ;;  %728 = vst.msk [vmem:[#allocation2 + $0x90] sm:$0xff] %vm678_vm2, %v653_v24  ;;  %v528_v40 = vadd.f32 %v2351_v34, %v2584_v26  ;;  %v519_v41 = vpop.f32.mrb[9].mxu0  ;;  %v1330_v46 = vmul.f32 %v2620_v9, %v2647_v37 }
  0xf7   : > { %v1128_v36 = vmul.f32 %v2625_v13, %v1092_v25  ;;  %v1025_v42 = vld [vmem:[#allocation2 + $0x2f] sm:$0xff]  ;;  %v1398_v47 = vmul.f32 %v2622_v10, %v2649_v38  ;;  %v1429_v48 = vadd.f32 %v1397_v29, %v1329_v28  ;;  %726 = vst.msk [vmem:[#allocation2 + $0x70] sm:$0xff] %vm678_vm2, %v651_v31  ;;  %v520_v49 = vadd.f32 %v2584_v26, %v519_v41  ;;  %v2352_v50 = vpop.f32.mrb[10].mxu0  ;;  %v2680_v31 = vld [vmem:[%s3591_s4] ss:$0 sm:$0xff] }
  0xf8   : > { %v1093_v43 = vld [vmem:[#allocation2 + $0x30] sm:$0xff]  ;;  %v1061_v51 = vmul.f32 %v2613_v0, %v1025_v42  ;;  %v624_v56 = vmax.f32 %v528_v40, 0.0  ;;  %v531_v57 = vadd.f32 %v2352_v50, %v2584_v26  ;;  %v522_v58 = vpop.f32.mrb[11].mxu0  ;;  %v795_v19 = vmul.f32 %v1025_v42, %v2590_v32 }
  0xf9   : > { %v1192_v44 = vld [vmem:[#allocation2 + $0x29] sm:$0xff]  ;;  %v1129_v52 = vmul.f32 %v2625_v13, %v1093_v43  ;;  %v1160_v53 = vadd.f32 %v1128_v36, %v1060_v35  ;;  %v1193_v54 = vld [vmem:[#allocation2 + $0x31] sm:$0xff]  ;;  %v622_v62 = vmax.f32 %v520_v49, 0.0  ;;  %v523_v63 = vadd.f32 %v2584_v26, %v522_v58 }
  0xfa   : > { %v2662_v55 = vld [vmem:[#allocation2 + $0x49] sm:$0xff]  ;;  %v1228_v59 = vmul.f32 %v2627_v16, %v1192_v44  ;;  %v1229_v60 = vmul.f32 %v2627_v16, %v1193_v54  ;;  %v2667_v61 = vld [vmem:[#allocation2 + $0x51] sm:$0xff]  ;;  %v1430_v2 = vadd.f32 %v1398_v47, %v1330_v46  ;;  %v656_v3 = vmin.f32 %v624_v56, 6.0 }
  0xfb   : > { %v1161_v1 = vadd.f32 %v1129_v52, %v1061_v51  ;;  %v625_v4 = vmax.f32 %v531_v57, 0.0  ;;  %v1497_v6 = vmul.f32 %v2629_v17, %v2662_v55  ;;  %v654_v7 = vmin.f32 %v622_v62, 6.0 }
  0xfc   : > { %v1260_v5 = vadd.f32 %v1228_v59, %v1160_v53  ;;  %v623_v8 = vmax.f32 %v523_v63, 0.0  ;;  %v1498_v12 = vmul.f32 %v2629_v17, %v2667_v61  ;;  %731 = vst.msk [vmem:[#allocation2 + $0xc8] sm:$0xff] %vm678_vm2, %v656_v3  ;;  %v862_v34 = vmul.f32 %v1092_v25, %v2592_v33 }
  0xfd   : > { %v1261_v11 = vadd.f32 %v1229_v60, %v1161_v1  ;;  %v657_v14 = vmin.f32 %v625_v4, 6.0  ;;  %v1529_v15 = vadd.f32 %v1497_v6, %v1429_v48  ;;  %729 = vst.msk [vmem:[#allocation2 + $0xa8] sm:$0xff] %vm678_vm2, %v654_v7  ;;  %v2355_v27 = vpop.f32.mrb[12].mxu0  ;;  %v863_v40 = vmul.f32 %v1093_v43, %v2592_v33  ;;  %v2696_v1 = vld [vmem:[#allocation2 + $0x67] sm:$0xff] }
  0xfe   : > { %v1561_v18 = vadd.f32 %v1260_v5, %v992_v20  ;;  %v655_v24 = vmin.f32 %v623_v8, 6.0  ;;  %v1530_v28 = vadd.f32 %v1498_v12, %v1430_v2  ;;  %v544_v35 = vadd.f32 %v2355_v27, %v2584_v26  ;;  %v535_v20 = vpop.f32.mrb[13].mxu0  ;;  %v2703_v6 = vld [vmem:[#allocation2 + $0x6f] sm:$0xff] }
  0xff   : > { %v1562_v29 = vadd.f32 %v1261_v11, %v993_v21  ;;  %732 = vst.msk [vmem:[#allocation2 + $0xd0] sm:$0xff] %vm678_vm2, %v657_v14  ;;  %v962_v41 = vmul.f32 %v1192_v44, %v2597_v45  ;;  %v536_v21 = vadd.f32 %v2584_v26, %v535_v20  ;;  %v2356_v42 = vpop.f32.mrb[14].mxu0  ;;  %v894_v47 = vadd.f32 %v862_v34, %v794_v39  ;;  %v2705_v7 = vld [vmem:[#allocation2 + $0x68] sm:$0xff] }
 0x100   : > { %v1593_v36 = vadd.f32 %v1561_v18, %v1529_v15  ;;  %730 = vst.msk [vmem:[#allocation2 + $0xb0] sm:$0xff] %vm678_vm2, %v655_v24  ;;  %v963_v48 = vmul.f32 %v1193_v54, %v2597_v45  ;;  %v628_v25 = vmax.f32 %v544_v35, 0.0  ;;  %v547_v49 = vadd.f32 %v2356_v42, %v2584_v26  ;;  %v538_v50 = vpop.f32.mrb[15].mxu0 }
 0x101   : > { %v1594_v46 = vadd.f32 %v1562_v29, %v1530_v28  ;;  %v895_v52 = vadd.f32 %v863_v40, %v795_v19  ;;  %v626_v53 = vmax.f32 %v536_v21, 0.0  ;;  %v539_v43 = vadd.f32 %v2584_v26, %v538_v50  ;;  %v2717_v29 = vld [vmem:[#allocation2 + $0x70] sm:$0xff] }
 0x102   : > { %v1632_v51 = vadd.f32 %v2680_v31, %v1593_v36  ;;  %v994_v56 = vadd.f32 %v962_v41, %v894_v47  ;;  %v660_v57 = vmin.f32 %v628_v25, 6.0  ;;  %v629_v58 = vmax.f32 %v547_v49, 0.0  ;;  %v2725_v41 = vld [vmem:[#allocation2 + $0x69] sm:$0xff] }
 0x103   : > { %v1633_v44 = vadd.f32 %v2680_v31, %v1594_v46  ;;  %v995_v60 = vadd.f32 %v963_v48, %v895_v52  ;;  %v658_v39 = vmin.f32 %v626_v53, 6.0  ;;  %v627_v62 = vmax.f32 %v539_v43, 0.0 }
 0x104   : > { %v1664_v59 = vmax.f32 %v1632_v51, 0.0  ;;  %v1063_v63 = vmul.f32 %v2647_v37, %v2613_v0  ;;  %735 = vst.msk [vmem:[#allocation2 + $0x108] sm:$0xff] %vm678_vm2, %v660_v57  ;;  %v661_v2 = vmin.f32 %v629_v58, 6.0  ;;  %v1130_v4 = vmul.f32 %v2633_v23, %v2625_v13 }
 0x105   : > { %v1665_v54 = vmax.f32 %v1633_v44, 0.0  ;;  %v1131_v5 = vmul.f32 %v2649_v38, %v2625_v13  ;;  %733 = vst.msk [vmem:[#allocation2 + $0xe8] sm:$0xff] %vm678_vm2, %v658_v39  ;;  %v659_v8 = vmin.f32 %v627_v62, 6.0  ;;  %v2359_v11 = vpop.f32.mrb[16].mxu0  ;;  %v1230_v14 = vmul.f32 %v2662_v55, %v2627_v16 }
 0x106   : > { %v1696_v3 = vmin.f32 %v1664_v59, 6.0  ;;  %v1231_v15 = vmul.f32 %v2667_v61, %v2627_v16  ;;  %736 = vst.msk [vmem:[#allocation2 + $0x110] sm:$0xff] %vm678_vm2, %v661_v2  ;;  %v560_v18 = vadd.f32 %v2359_v11, %v2584_v26  ;;  %v551_v19 = vpop.f32.mrb[17].mxu0  ;;  %v1162_v24 = vadd.f32 %v1130_v4, %v2642_v30  ;;  %v2727_v30 = vld [vmem:[#allocation2 + $0x71] sm:$0xff] }
 0x107   : > { %v1697_v12 = vmin.f32 %v1665_v54, 6.0  ;;  %v1163_v27 = vadd.f32 %v1131_v5, %v1063_v63  ;;  %v1331_v28 = vmul.f32 %v2620_v9, %v2696_v1  ;;  %734 = vst.msk [vmem:[#allocation2 + $0xf0] sm:$0xff] %vm678_vm2, %v659_v8  ;;  %v552_v34 = vadd.f32 %v2584_v26, %v551_v19  ;;  %v2360_v35 = vpop.f32.mrb[18].mxu0 }
 0x108   : > { %v1332_v36 = vmul.f32 %v2620_v9, %v2703_v6  ;;  %v1399_v40 = vmul.f32 %v2622_v10, %v2705_v7  ;;  %v632_v21 = vmax.f32 %v560_v18, 0.0  ;;  %v563_v42 = vadd.f32 %v2360_v35, %v2584_v26  ;;  %v554_v46 = vpop.f32.mrb[19].mxu0 }
 0x109   : > { %v1728_v20 = vpack.c.bf16 %v1697_v12, %v1696_v3  ;;  %v1262_v47 = vadd.f32 %v1230_v14, %v1162_v24  ;;  %v1263_v48 = vadd.f32 %v1231_v15, %v1163_v27  ;;  %v630_v25 = vmax.f32 %v552_v34, 0.0 }
 0x10a   : > { %v555_v49 = vadd.f32 %v2584_v26, %v554_v46  ;;  %v1400_v50 = vmul.f32 %v2622_v10, %v2717_v29  ;;  %v1431_v51 = vadd.f32 %v1399_v40, %v1331_v28  ;;  %v664_v52 = vmin.f32 %v632_v21, 6.0 }
 0x10b   : > { %2377 = vmatprep.mubr.msk.bf16.mxu1 %vm678_vm2, %v1728_v20  ;;  %v633_v53 = vmax.f32 %v563_v42, 0.0  ;;  %v1499_v43 = vmul.f32 %v2629_v17, %v2725_v41  ;;  %v1500_v44 = vmul.f32 %v2629_v17, %v2727_v30  ;;  %v662_v57 = vmin.f32 %v630_v25, 6.0 }
 0x10c   : > { %v631_v58 = vmax.f32 %v555_v49, 0.0  ;;  %v1432_v59 = vadd.f32 %v1400_v50, %v1332_v36  ;;  %v1563_v39 = vadd.f32 %v1262_v47, %v994_v56  ;;  %739 = vst.msk [vmem:[#allocation2 + $0x148] sm:$0xff] %vm678_vm2, %v664_v52  ;;  %v1564_v63 = vadd.f32 %v1263_v48, %v995_v60  ;;  %v2762_v49 = vld [vmem:[#allocation2 + $0x87] sm:$0xff]  ;;  %v2764_v50 = vld [vmem:[#allocation2 + $0x8f] sm:$0xff] }
 0x10d   : > { %v665_v62 = vmin.f32 %v633_v53, 6.0  ;;  %v1531_v54 = vadd.f32 %v1499_v43, %v1431_v51  ;;  %v796_v2 = vmul.f32 %v2631_v22, %v2590_v32  ;;  %737 = vst.msk [vmem:[#allocation2 + $0x128] sm:$0xff] %vm678_vm2, %v662_v57  ;;  %v2363_v4 = vpop.f32.mrb[20].mxu0  ;;  %v797_v8 = vmul.f32 %v2647_v37, %v2590_v32  ;;  %v2773_v57 = vld [vmem:[#allocation2 + $0x90] sm:$0xff] }
 0x10e   : > { %v663_v3 = vmin.f32 %v631_v58, 6.0  ;;  %v1532_v5 = vadd.f32 %v1500_v44, %v1432_v59  ;;  %v864_v11 = vmul.f32 %v2633_v23, %v2592_v33  ;;  %v576_v56 = vadd.f32 %v2363_v4, %v2584_v26  ;;  %v567_v12 = vpop.f32.mrb[21].mxu0  ;;  %v2771_v44 = vld [vmem:[#allocation2 + $0x88] sm:$0xff] }
 0x10f   : > { %740 = vst.msk [vmem:[#allocation2 + $0x150] sm:$0xff] %vm678_vm2, %v665_v62  ;;  %v1595_v60 = vadd.f32 %v1563_v39, %v1531_v54  ;;  %v865_v22 = vmul.f32 %v2649_v38, %v2592_v33  ;;  %v964_v14 = vmul.f32 %v2662_v55, %v2597_v45  ;;  %v568_v15 = vadd.f32 %v2584_v26, %v567_v12  ;;  %v2364_v37 = vpop.f32.mrb[22].mxu0  ;;  %v2780_v54 = vld [vmem:[#allocation2 + $0x89] sm:$0xff] }
 0x110   : > { %738 = vst.msk [vmem:[#allocation2 + $0x130] sm:$0xff] %vm678_vm2, %v663_v3  ;;  %v1596_v18 = vadd.f32 %v1564_v63, %v1532_v5  ;;  %v896_v19 = vadd.f32 %v864_v11, %v796_v2  ;;  %v965_v23 = vmul.f32 %v2667_v61, %v2597_v45  ;;  %v636_v24 = vmax.f32 %v576_v56, 0.0  ;;  %v570_v34 = vpop.f32.mrb[23].mxu0  ;;  %v2782_v63 = vld [vmem:[#allocation2 + $0x91] sm:$0xff] }
 0x111   : > { %v579_v27 = vadd.f32 %v2364_v37, %v2584_v26  ;;  %v1634_v28 = vadd.f32 %v2680_v31, %v1595_v60  ;;  %v897_v38 = vadd.f32 %v865_v22, %v797_v8  ;;  %v634_v35 = vmax.f32 %v568_v15, 0.0 }
 0x112   : > { %v1635_v55 = vadd.f32 %v2680_v31, %v1596_v18  ;;  %v571_v20 = vadd.f32 %v2584_v26, %v570_v34  ;;  %v996_v36 = vadd.f32 %v964_v14, %v896_v19  ;;  %v668_v40 = vmin.f32 %v636_v24, 6.0 }
 0x113   : > { %v637_v21 = vmax.f32 %v579_v27, 0.0  ;;  %v1666_v42 = vmax.f32 %v1634_v28, 0.0  ;;  %v997_v46 = vadd.f32 %v965_v23, %v897_v38  ;;  %v666_v47 = vmin.f32 %v634_v35, 6.0 }
 0x114   : > { %v1667_v48 = vmax.f32 %v1635_v55, 0.0  ;;  %v635_v61 = vmax.f32 %v571_v20, 0.0  ;;  %v1064_v25 = vmul.f32 %v2696_v1, %v2613_v0  ;;  %743 = vst.msk [vmem:[#allocation2 + $0x188] sm:$0xff] %vm678_vm2, %v668_v40  ;;  %v1065_v53 = vmul.f32 %v2703_v6, %v2613_v0 }
 0x115   : > { %v669_v51 = vmin.f32 %v637_v21, 6.0  ;;  %v1698_v52 = vmin.f32 %v1666_v42, 6.0  ;;  %v1132_v43 = vmul.f32 %v2705_v7, %v2625_v13  ;;  %741 = vst.msk [vmem:[#allocation2 + $0x168] sm:$0xff] %vm678_vm2, %v666_v47  ;;  %v1133_v39 = vmul.f32 %v2717_v29, %v2625_v13  ;;  %v2367_v2 = vpop.f32.mrb[24].mxu0 }
 0x116   : > { %v1699_v58 = vmin.f32 %v1667_v48, 6.0  ;;  %v667_v59 = vmin.f32 %v635_v61, 6.0  ;;  %v1232_v62 = vmul.f32 %v2725_v41, %v2627_v16  ;;  %v1233_v4 = vmul.f32 %v2727_v30, %v2627_v16  ;;  %v583_v11 = vpop.f32.mrb[25].mxu0 }
 0x117   : > { %744 = vst.msk [vmem:[#allocation2 + $0x190] sm:$0xff] %vm678_vm2, %v669_v51  ;;  %v1164_v3 = vadd.f32 %v1132_v43, %v1064_v25  ;;  %v1333_v5 = vmul.f32 %v2620_v9, %v2762_v49  ;;  %v1334_v8 = vmul.f32 %v2620_v9, %v2764_v50  ;;  %v1165_v12 = vadd.f32 %v1133_v39, %v1065_v53  ;;  %v2368_v14 = vpop.f32.mrb[26].mxu0 }
 0x118   : > { %v1729_v56 = vpack.c.bf16 %v1699_v58, %v1698_v52  ;;  %742 = vst.msk [vmem:[#allocation2 + $0x170] sm:$0xff] %vm678_vm2, %v667_v59  ;;  %v1401_v60 = vmul.f32 %v2622_v10, %v2771_v44  ;;  %v1402_v22 = vmul.f32 %v2622_v10, %v2773_v57  ;;  %v1501_v37 = vmul.f32 %v2629_v17, %v2780_v54  ;;  %v2801_v23 = vpop.f32.mrb[27].mxu0 }
 0x119   : > { %v1264_v15 = vadd.f32 %v1232_v62, %v1164_v3  ;;  %v1502_v18 = vmul.f32 %v2629_v17, %v2782_v63  ;;  %v592_v19 = vadd.f32 %v2367_v2, %v2584_v26  ;;  %v1265_v24 = vadd.f32 %v1233_v4, %v1165_v12  ;;  %v2828_v3 = vld [vmem:[#allocation2 + $0xa7] sm:$0xff] }
 0x11a   : > { %2378 = vmatmul.mubr.msk.bf16.vlgmr.msra.gmra.mrb[0].mxu1 %vm678_vm2, %v1729_v56  ;;  %v1433_v27 = vadd.f32 %v1401_v60, %v1333_v5  ;;  %v1434_v28 = vadd.f32 %v1402_v22, %v1334_v8  ;;  %v584_v34 = vadd.f32 %v2584_v26, %v583_v11  ;;  %v595_v55 = vadd.f32 %v2368_v14, %v2584_v26  ;;  %v2839_v11 = vld [vmem:[#allocation2 + $0xaf] sm:$0xff] }
 0x11b   : > { %v1565_v38 = vadd.f32 %v1264_v15, %v996_v36  ;;  %v640_v35 = vmax.f32 %v592_v19, 0.0  ;;  %v798_v20 = vmul.f32 %v2696_v1, %v2590_v32  ;;  %v1566_v42 = vadd.f32 %v1265_v24, %v997_v46  ;;  %v2841_v56 = vld [vmem:[#allocation2 + $0xa8] sm:$0xff] }
 0x11c   : > { %v1533_v40 = vadd.f32 %v1501_v37, %v1433_v27  ;;  %v1534_v21 = vadd.f32 %v1502_v18, %v1434_v28  ;;  %v638_v47 = vmax.f32 %v584_v34, 0.0  ;;  %v641_v61 = vmax.f32 %v595_v55, 0.0  ;;  %v2847_v37 = vld [vmem:[#allocation2 + $0xb0] sm:$0xff] }
 0x11d   : > { %v672_v48 = vmin.f32 %v640_v35, 6.0  ;;  %v799_v25 = vmul.f32 %v2703_v6, %v2590_v32  ;;  %v866_v51 = vmul.f32 %v2705_v7, %v2592_v33  ;;  %v867_v43 = vmul.f32 %v2717_v29, %v2592_v33  ;;  %v2814_v58 = vpop.f32.mrb[28].mxu0  ;;  %v2849_v18 = vld [vmem:[#allocation2 + $0xa9] sm:$0xff]  ;;  %v2855_v34 = vld [vmem:[#allocation2 + $0xb1] sm:$0xff] }
 0x11e   : > { %v1597_v52 = vadd.f32 %v1565_v38, %v1533_v40  ;;  %v1598_v36 = vadd.f32 %v1566_v42, %v1534_v21  ;;  %v670_v53 = vmin.f32 %v638_v47, 6.0  ;;  %v673_v1 = vmin.f32 %v641_v61, 6.0  ;;  %v2821_v39 = vpop.f32.mrb[29].mxu0 }
 0x11f   : > { %747 = vst.msk [vmem:[#allocation2 + $0x1c8] sm:$0xff] %vm678_vm2, %v672_v48  ;;  %v898_v46 = vadd.f32 %v866_v51, %v798_v20  ;;  %v966_v59 = vmul.f32 %v2725_v41, %v2597_v45  ;;  %v967_v6 = vmul.f32 %v2727_v30, %v2597_v45  ;;  %v899_v29 = vadd.f32 %v867_v43, %v799_v25  ;;  %v2830_v4 = vpop.f32.mrb[30].mxu0 }
 0x120   : > { %v1636_v7 = vadd.f32 %v2680_v31, %v1597_v52  ;;  %v1637_v62 = vadd.f32 %v2680_v31, %v1598_v36  ;;  %745 = vst.msk [vmem:[#allocation2 + $0x1a8] sm:$0xff] %vm678_vm2, %v670_v53  ;;  %v1066_v2 = vmul.f32 %v2762_v49, %v2613_v0  ;;  %748 = vst.msk [vmem:[#allocation2 + $0x1d0] sm:$0xff] %vm678_vm2, %v673_v1  ;;  %v2843_v12 = vpop.f32.mrb[31].mxu0 }
 0x121   : > { %v998_v41 = vadd.f32 %v966_v59, %v898_v46  ;;  %v1067_v30 = vmul.f32 %v2764_v50, %v2613_v0  ;;  %v1134_v5 = vmul.f32 %v2771_v44, %v2625_v13  ;;  %v1135_v8 = vmul.f32 %v2773_v57, %v2625_v13 }
 0x122   : > { %v1668_v60 = vmax.f32 %v1636_v7, 0.0  ;;  %v1669_v22 = vmax.f32 %v1637_v62, 0.0  ;;  %v999_v14 = vadd.f32 %v967_v6, %v899_v29  ;;  %v1234_v15 = vmul.f32 %v2780_v54, %v2627_v16 }
 0x123   : > { %v1166_v19 = vadd.f32 %v1134_v5, %v1066_v2  ;;  %v1167_v24 = vadd.f32 %v1135_v8, %v1067_v30  ;;  %v1235_v27 = vmul.f32 %v2782_v63, %v2627_v16  ;;  %v1335_v28 = vmul.f32 %v2620_v9, %v2828_v3  ;;  %v2888_v8 = vld [vmem:[#allocation2 + $0xc7] sm:$0xff] }
 0x124   : > { %v1700_v38 = vmin.f32 %v1668_v60, 6.0  ;;  %v1701_v35 = vmin.f32 %v1669_v22, 6.0  ;;  %v1336_v55 = vmul.f32 %v2620_v9, %v2839_v11  ;;  %v1403_v20 = vmul.f32 %v2622_v10, %v2841_v56 }
 0x125   : > { %v1266_v40 = vadd.f32 %v1234_v15, %v1166_v19  ;;  %v1267_v21 = vadd.f32 %v1235_v27, %v1167_v24  ;;  %v1404_v42 = vmul.f32 %v2622_v10, %v2847_v37  ;;  %v1503_v47 = vmul.f32 %v2629_v17, %v2849_v18  ;;  %v2898_v15 = vld [vmem:[#allocation2 + $0xc8] sm:$0xff]  ;;  %v2900_v19 = vld [vmem:[#allocation2 + $0xd0] sm:$0xff] }
 0x126   : > { %v1730_v48 = vpack.c.bf16 %v1701_v35, %v1700_v38  ;;  %v1435_v61 = vadd.f32 %v1403_v20, %v1335_v28  ;;  %v1504_v25 = vmul.f32 %v2629_v17, %v2855_v34  ;;  %v587_v51 = vadd.f32 %v2584_v26, %v2801_v23  ;;  %v2905_v35 = vld [vmem:[#allocation2 + $0xc9] sm:$0xff] }
 0x127   : > { %v1436_v52 = vadd.f32 %v1404_v42, %v1336_v55  ;;  %v1567_v36 = vadd.f32 %v1266_v40, %v998_v41  ;;  %v1568_v53 = vadd.f32 %v1267_v21, %v999_v14  ;;  %v800_v43 = vmul.f32 %v2762_v49, %v2590_v32  ;;  %v2907_v55 = vld [vmem:[#allocation2 + $0xd1] sm:$0xff] }
 0x128   : > { %2381 = vmatprep.mubr.msk.bf16.mxu1 %vm678_vm2, %v1730_v48  ;;  %v1535_v1 = vadd.f32 %v1503_v47, %v1435_v61  ;;  %v639_v46 = vmax.f32 %v587_v51, 0.0  ;;  %v801_v59 = vmul.f32 %v2764_v50, %v2590_v32  ;;  %v868_v6 = vmul.f32 %v2771_v44, %v2592_v33 }
 0x129   : > { %v1536_v7 = vadd.f32 %v1504_v25, %v1436_v52  ;;  %v869_v23 = vmul.f32 %v2773_v57, %v2592_v33  ;;  %v968_v62 = vmul.f32 %v2780_v54, %v2597_v45  ;;  %v969_v49 = vmul.f32 %v2782_v63, %v2597_v45  ;;  %v2890_v54 = vld [vmem:[#allocation2 + $0xcf] sm:$0xff] }
 0x12a   : > { %v1599_v29 = vadd.f32 %v1567_v36, %v1535_v1  ;;  %v671_v2 = vmin.f32 %v639_v46, 6.0  ;;  %v900_v41 = vadd.f32 %v868_v6, %v800_v43  ;;  %v1068_v30 = vmul.f32 %v2828_v3, %v2613_v0 }
 0x12b   : > { %v1600_v50 = vadd.f32 %v1568_v53, %v1536_v7  ;;  %v901_v5 = vadd.f32 %v869_v23, %v801_v59  ;;  %v1069_v44 = vmul.f32 %v2839_v11, %v2613_v0  ;;  %v1136_v57 = vmul.f32 %v2841_v56, %v2625_v13 }
 0x12c   : > { %v1638_v63 = vadd.f32 %v2680_v31, %v1599_v29  ;;  %746 = vst.msk [vmem:[#allocation2 + $0x1b0] sm:$0xff] %vm678_vm2, %v671_v2  ;;  %v1000_v60 = vadd.f32 %v968_v62, %v900_v41  ;;  %v1137_v22 = vmul.f32 %v2847_v37, %v2625_v13  ;;  %v1236_v14 = vmul.f32 %v2849_v18, %v2627_v16 }
 0x12d   : > { %v1639_v24 = vadd.f32 %v2680_v31, %v1600_v50  ;;  %v1001_v27 = vadd.f32 %v969_v49, %v901_v5  ;;  %v1168_v28 = vadd.f32 %v1136_v57, %v1068_v30  ;;  %v1237_v38 = vmul.f32 %v2855_v34, %v2627_v16 }
 0x12e   : > { %v1670_v20 = vmax.f32 %v1638_v63, 0.0  ;;  %v1169_v40 = vadd.f32 %v1137_v22, %v1069_v44  ;;  %v1337_v21 = vmul.f32 %v2620_v9, %v2888_v8  ;;  %v1338_v42 = vmul.f32 %v2620_v9, %v2890_v54 }
 0x12f   : > { %v1671_v47 = vmax.f32 %v1639_v24, 0.0  ;;  %v1268_v48 = vadd.f32 %v1236_v14, %v1168_v28  ;;  %v1405_v61 = vmul.f32 %v2622_v10, %v2898_v15  ;;  %v1406_v25 = vmul.f32 %v2622_v10, %v2900_v19 }
 0x130   : > { %v1702_v51 = vmin.f32 %v1670_v20, 6.0  ;;  %v1269_v52 = vadd.f32 %v1237_v38, %v1169_v40  ;;  %v1505_v36 = vmul.f32 %v2629_v17, %v2905_v35  ;;  %v1506_v53 = vmul.f32 %v2629_v17, %v2907_v55  ;;  %v2951_v38 = vld [vmem:[#allocation2 + $0xe7] sm:$0xff] }
 0x131   : > { %v1703_v43 = vmin.f32 %v1671_v47, 6.0  ;;  %v1437_v1 = vadd.f32 %v1405_v61, %v1337_v21  ;;  %v1438_v46 = vadd.f32 %v1406_v25, %v1338_v42  ;;  %v1569_v59 = vadd.f32 %v1268_v48, %v1000_v60  ;;  %v2955_v47 = vld [vmem:[#allocation2 + $0xef] sm:$0xff] }
 0x132   : > { %v1570_v6 = vadd.f32 %v1269_v52, %v1001_v27  ;;  %v608_v7 = vadd.f32 %v2814_v58, %v2584_v26  ;;  %v600_v23 = vadd.f32 %v2584_v26, %v2821_v39  ;;  %v611_v62 = vadd.f32 %v2830_v4, %v2584_v26  ;;  %v2959_v48 = vld [vmem:[#allocation2 + $0xf0] sm:$0xff] }
 0x133   : > { %v1731_v49 = vpack.c.bf16 %v1703_v43, %v1702_v51  ;;  %v1537_v29 = vadd.f32 %v1505_v36, %v1437_v1  ;;  %v1538_v2 = vadd.f32 %v1506_v53, %v1438_v46  ;;  %v802_v41 = vmul.f32 %v2828_v3, %v2590_v32  ;;  %v2965_v36 = vld [vmem:[#allocation2 + $0xe9] sm:$0xff]  ;;  %v2967_v53 = vld [vmem:[#allocation2 + $0xf1] sm:$0xff] }
 0x134   : > { %v644_v30 = vmax.f32 %v608_v7, 0.0  ;;  %v642_v50 = vmax.f32 %v600_v23, 0.0  ;;  %v645_v5 = vmax.f32 %v611_v62, 0.0  ;;  %v803_v44 = vmul.f32 %v2839_v11, %v2590_v32 }
 0x135   : > { %2382 = vmatmul.mubr.msk.bf16.gmra.mrb[4].mxu1 %vm678_vm2, %v1731_v49  ;;  %v1601_v58 = vadd.f32 %v1569_v59, %v1537_v29  ;;  %v1602_v57 = vadd.f32 %v1570_v6, %v1538_v2  ;;  %v870_v39 = vmul.f32 %v2841_v56, %v2592_v33  ;;  %v871_v4 = vmul.f32 %v2847_v37, %v2592_v33 }
 0x136   : > { %v676_v63 = vmin.f32 %v644_v30, 6.0  ;;  %v674_v60 = vmin.f32 %v642_v50, 6.0  ;;  %v677_v22 = vmin.f32 %v645_v5, 6.0  ;;  %v970_v3 = vmul.f32 %v2849_v18, %v2597_v45 }
 0x137   : > { %v1640_v14 = vadd.f32 %v2680_v31, %v1601_v58  ;;  %v1641_v11 = vadd.f32 %v2680_v31, %v1602_v57  ;;  %v902_v24 = vadd.f32 %v870_v39, %v802_v41  ;;  %v903_v27 = vadd.f32 %v871_v4, %v803_v44 }
 0x138   : > { %751 = vst.msk [vmem:[#allocation2 + $0x208] sm:$0xff] %vm678_vm2, %v676_v63  ;;  %749 = vst.msk [vmem:[#allocation2 + $0x1e8] sm:$0xff] %vm678_vm2, %v674_v60  ;;  %v971_v56 = vmul.f32 %v2855_v34, %v2597_v45  ;;  %v1070_v37 = vmul.f32 %v2888_v8, %v2613_v0  ;;  %v1071_v18 = vmul.f32 %v2890_v54, %v2613_v0  ;;  %v2957_v34 = vld [vmem:[#allocation2 + $0xe8] sm:$0xff] }
 0x139   : > { %752 = vst.msk [vmem:[#allocation2 + $0x210] sm:$0xff] %vm678_vm2, %v677_v22  ;;  %v1138_v28 = vmul.f32 %v2898_v15, %v2625_v13  ;;  %v1672_v20 = vmax.f32 %v1640_v14, 0.0  ;;  %v1673_v40 = vmax.f32 %v1641_v11, 0.0  ;;  %v1002_v21 = vadd.f32 %v970_v3, %v902_v24 }
 0x13a   : > { %v1139_v42 = vmul.f32 %v2900_v19, %v2625_v13  ;;  %v1003_v61 = vadd.f32 %v971_v56, %v903_v27  ;;  %v1238_v51 = vmul.f32 %v2905_v35, %v2627_v16  ;;  %v1239_v52 = vmul.f32 %v2907_v55, %v2627_v16  ;;  %v2998_v27 = vld [vmem:[#allocation2 + $0x107] sm:$0xff] }
 0x13b   : > { %v1170_v25 = vadd.f32 %v1138_v28, %v1070_v37  ;;  %v1704_v43 = vmin.f32 %v1672_v20, 6.0  ;;  %v1705_v1 = vmin.f32 %v1673_v40, 6.0  ;;  %v1339_v59 = vmul.f32 %v2620_v9, %v2951_v38 }
 0x13c   : > { %v1171_v46 = vadd.f32 %v1139_v42, %v1071_v18  ;;  %v1340_v7 = vmul.f32 %v2620_v9, %v2955_v47  ;;  %v1407_v23 = vmul.f32 %v2622_v10, %v2957_v34  ;;  %v1408_v62 = vmul.f32 %v2622_v10, %v2959_v48  ;;  %v3008_v18 = vld [vmem:[#allocation2 + $0x108] sm:$0xff]  ;;  %v3015_v42 = vld [vmem:[#allocation2 + $0x110] sm:$0xff] }
 0x13d   : > { %v1270_v6 = vadd.f32 %v1238_v51, %v1170_v25  ;;  %v1732_v49 = vpack.c.bf16 %v1705_v1, %v1704_v43  ;;  %v1507_v2 = vmul.f32 %v2629_v17, %v2965_v36  ;;  %v1508_v41 = vmul.f32 %v2629_v17, %v2967_v53  ;;  %v3023_v1 = vld [vmem:[#allocation2 + $0x111] sm:$0xff] }
 0x13e   : > { %v1271_v29 = vadd.f32 %v1239_v52, %v1171_v46  ;;  %v1439_v30 = vadd.f32 %v1407_v23, %v1339_v59  ;;  %v1440_v50 = vadd.f32 %v1408_v62, %v1340_v7  ;;  %v603_v44 = vadd.f32 %v2584_v26, %v2843_v12 }
 0x13f   : > { %v1571_v5 = vadd.f32 %v1270_v6, %v1002_v21  ;;  %2385 = vmatprep.mubr.msk.bf16.mxu1 %vm678_vm2, %v1732_v49  ;;  %v804_v57 = vmul.f32 %v2888_v8, %v2590_v32  ;;  %v805_v39 = vmul.f32 %v2890_v54, %v2590_v32  ;;  %v872_v4 = vmul.f32 %v2898_v15, %v2592_v33 }
 0x140   : > { %v1572_v58 = vadd.f32 %v1271_v29, %v1003_v61  ;;  %v1539_v63 = vadd.f32 %v1507_v2, %v1439_v30  ;;  %v1540_v60 = vadd.f32 %v1508_v41, %v1440_v50  ;;  %v643_v22 = vmax.f32 %v603_v44, 0.0  ;;  %v3017_v61 = vld [vmem:[#allocation2 + $0x109] sm:$0xff] }
 0x141   : > { %v873_v3 = vmul.f32 %v2900_v19, %v2592_v33  ;;  %v904_v14 = vadd.f32 %v872_v4, %v804_v57  ;;  %v972_v26 = vmul.f32 %v2905_v35, %v2597_v45  ;;  %v973_v12 = vmul.f32 %v2907_v55, %v2597_v45  ;;  %v3006_v55 = vld [vmem:[#allocation2 + $0x10f] sm:$0xff] }
 0x142   : > { %v1072_v8 = vmul.f32 %v2951_v38, %v2613_v0  ;;  %v1603_v54 = vadd.f32 %v1571_v5, %v1539_v63  ;;  %v1604_v11 = vadd.f32 %v1572_v58, %v1540_v60  ;;  %v675_v24 = vmin.f32 %v643_v22, 6.0 }
 0x143   : > { %v905_v15 = vadd.f32 %v873_v3, %v805_v39  ;;  %v1004_v56 = vadd.f32 %v972_v26, %v904_v14  ;;  %v1073_v19 = vmul.f32 %v2955_v47, %v2613_v0  ;;  %v1140_v37 = vmul.f32 %v2957_v34, %v2625_v13 }
 0x144   : > { %v1141_v35 = vmul.f32 %v2959_v48, %v2625_v13  ;;  %v1642_v28 = vadd.f32 %v2680_v31, %v1603_v54  ;;  %v1643_v20 = vadd.f32 %v2680_v31, %v1604_v11  ;;  %750 = vst.msk [vmem:[#allocation2 + $0x1f0] sm:$0xff] %vm678_vm2, %v675_v24  ;;  %v1240_v21 = vmul.f32 %v2965_v36, %v2627_v16  ;;  %v3056_v11 = vld [vmem:[#allocation2 + $0x127] sm:$0xff] }
 0x145   : > { %v1005_v40 = vadd.f32 %v973_v12, %v905_v15  ;;  %v1172_v25 = vadd.f32 %v1140_v37, %v1072_v8  ;;  %v1241_v52 = vmul.f32 %v2967_v53, %v2627_v16  ;;  %v1341_v43 = vmul.f32 %v2620_v9, %v2998_v27  ;;  %v3060_v24 = vld [vmem:[#allocation2 + $0x128] sm:$0xff] }
 0x146   : > { %v1173_v51 = vadd.f32 %v1141_v35, %v1073_v19  ;;  %v1674_v46 = vmax.f32 %v1642_v28, 0.0  ;;  %v1675_v59 = vmax.f32 %v1643_v20, 0.0  ;;  %v1342_v6 = vmul.f32 %v2620_v9, %v3006_v55  ;;  %v3067_v35 = vld [vmem:[#allocation2 + $0x130] sm:$0xff] }
 0x147   : > { %v1409_v7 = vmul.f32 %v2622_v10, %v3008_v18  ;;  %v1272_v23 = vadd.f32 %v1240_v21, %v1172_v25  ;;  %v1410_v49 = vmul.f32 %v2622_v10, %v3015_v42  ;;  %v1509_v29 = vmul.f32 %v2629_v17, %v3017_v61  ;;  %v3070_v25 = vld [vmem:[#allocation2 + $0x129] sm:$0xff] }
 0x148   : > { %v1273_v62 = vadd.f32 %v1241_v52, %v1173_v51  ;;  %v1706_v2 = vmin.f32 %v1674_v46, 6.0  ;;  %v1707_v41 = vmin.f32 %v1675_v59, 6.0  ;;  %v1510_v50 = vmul.f32 %v2629_v17, %v3023_v1  ;;  %v3072_v51 = vld [vmem:[#allocation2 + $0x131] sm:$0xff] }
 0x149   : > { %v1441_v30 = vadd.f32 %v1409_v7, %v1341_v43  ;;  %v1442_v5 = vadd.f32 %v1410_v49, %v1342_v6  ;;  %v1573_v44 = vadd.f32 %v1272_v23, %v1004_v56  ;;  %v806_v57 = vmul.f32 %v2951_v38, %v2590_v32 }
 0x14a   : > { %v1574_v58 = vadd.f32 %v1273_v62, %v1005_v40  ;;  %v1733_v39 = vpack.c.bf16 %v1707_v41, %v1706_v2  ;;  %v807_v63 = vmul.f32 %v2955_v47, %v2590_v32  ;;  %v874_v60 = vmul.f32 %v2957_v34, %v2592_v33 }
 0x14b   : > { %v1541_v4 = vadd.f32 %v1509_v29, %v1441_v30  ;;  %v1542_v22 = vadd.f32 %v1510_v50, %v1442_v5  ;;  %v875_v3 = vmul.f32 %v2959_v48, %v2592_v33  ;;  %v974_v14 = vmul.f32 %v2965_v36, %v2597_v45 }
 0x14c   : > { %v975_v26 = vmul.f32 %v2967_v53, %v2597_v45  ;;  %2386 = vmatmul.mubr.msk.bf16.gmra.mrb[8].mxu1 %vm678_vm2, %v1733_v39  ;;  %v906_v12 = vadd.f32 %v874_v60, %v806_v57  ;;  %v1074_v47 = vmul.f32 %v2998_v27, %v2613_v0  ;;  %v1075_v34 = vmul.f32 %v3006_v55, %v2613_v0  ;;  %v3058_v53 = vld [vmem:[#allocation2 + $0x12f] sm:$0xff] }
 0x14d   : > { %v1605_v38 = vadd.f32 %v1573_v44, %v1541_v4  ;;  %v1606_v8 = vadd.f32 %v1574_v58, %v1542_v22  ;;  %v907_v54 = vadd.f32 %v875_v3, %v807_v63  ;;  %v1142_v48 = vmul.f32 %v3008_v18, %v2625_v13 }
 0x14e   : > { %v1143_v36 = vmul.f32 %v3015_v42, %v2625_v13  ;;  %v1006_v56 = vadd.f32 %v974_v14, %v906_v12  ;;  %v1242_v19 = vmul.f32 %v3017_v61, %v2627_v16  ;;  %v1243_v37 = vmul.f32 %v3023_v1, %v2627_v16 }
 0x14f   : > { %v1644_v15 = vadd.f32 %v2680_v31, %v1605_v38  ;;  %v1645_v28 = vadd.f32 %v2680_v31, %v1606_v8  ;;  %v1007_v20 = vadd.f32 %v975_v26, %v907_v54  ;;  %v1174_v40 = vadd.f32 %v1142_v48, %v1074_v47  ;;  %v3105_v47 = vld [vmem:[#allocation2 + $0x147] sm:$0xff] }
 0x150   : > { %v1175_v21 = vadd.f32 %v1143_v36, %v1075_v34  ;;  %v1343_v43 = vmul.f32 %v2620_v9, %v3056_v11  ;;  %v1344_v46 = vmul.f32 %v2620_v9, %v3058_v53  ;;  %v1411_v59 = vmul.f32 %v2622_v10, %v3060_v24  ;;  %v3114_v48 = vld [vmem:[#allocation2 + $0x148] sm:$0xff]  ;;  %v3116_v36 = vld [vmem:[#allocation2 + $0x150] sm:$0xff] }
 0x151   : > { %v1676_v52 = vmax.f32 %v1644_v15, 0.0  ;;  %v1677_v6 = vmax.f32 %v1645_v28, 0.0  ;;  %v1274_v7 = vadd.f32 %v1242_v19, %v1174_v40  ;;  %v1412_v62 = vmul.f32 %v2622_v10, %v3067_v35  ;;  %v3121_v28 = vld [vmem:[#allocation2 + $0x149] sm:$0xff] }
 0x152   : > { %v1275_v23 = vadd.f32 %v1243_v37, %v1175_v21  ;;  %v1443_v29 = vadd.f32 %v1411_v59, %v1343_v43  ;;  %v1511_v2 = vmul.f32 %v2629_v17, %v3070_v25  ;;  %v1512_v41 = vmul.f32 %v2629_v17, %v3072_v51 }
 0x153   : > { %v1708_v49 = vmin.f32 %v1676_v52, 6.0  ;;  %v1709_v30 = vmin.f32 %v1677_v6, 6.0  ;;  %v1444_v50 = vadd.f32 %v1412_v62, %v1344_v46  ;;  %v1575_v5 = vadd.f32 %v1274_v7, %v1006_v56 }
 0x154   : > { %v1576_v44 = vadd.f32 %v1275_v23, %v1007_v20  ;;  %v1543_v58 = vadd.f32 %v1511_v2, %v1443_v29  ;;  %v808_v57 = vmul.f32 %v2998_v27, %v2590_v32  ;;  %v809_v39 = vmul.f32 %v3006_v55, %v2590_v32  ;;  %v3123_v20 = vld [vmem:[#allocation2 + $0x151] sm:$0xff] }
 0x155   : > { %v876_v4 = vmul.f32 %v3008_v18, %v2592_v33  ;;  %v1734_v63 = vpack.c.bf16 %v1709_v30, %v1708_v49  ;;  %v1544_v60 = vadd.f32 %v1512_v41, %v1444_v50  ;;  %v877_v22 = vmul.f32 %v3015_v42, %v2592_v33 }
 0x156   : > { %v976_v3 = vmul.f32 %v3017_v61, %v2597_v45  ;;  %v1607_v14 = vadd.f32 %v1575_v5, %v1543_v58  ;;  %v977_v38 = vmul.f32 %v3023_v1, %v2597_v45  ;;  %v1076_v27 = vmul.f32 %v3056_v11, %v2613_v0  ;;  %v3107_v61 = vld [vmem:[#allocation2 + $0x14f] sm:$0xff] }
 0x157   : > { %v908_v26 = vadd.f32 %v876_v4, %v808_v57  ;;  %2389 = vmatprep.mubr.msk.bf16.mxu1 %vm678_vm2, %v1734_v63  ;;  %v1608_v55 = vadd.f32 %v1576_v44, %v1544_v60  ;;  %v909_v18 = vadd.f32 %v877_v22, %v809_v39  ;;  %v1077_v12 = vmul.f32 %v3058_v53, %v2613_v0 }
 0x158   : > { %v1144_v42 = vmul.f32 %v3060_v24, %v2625_v13  ;;  %v1646_v34 = vadd.f32 %v2680_v31, %v1607_v14  ;;  %v1145_v8 = vmul.f32 %v3067_v35, %v2625_v13  ;;  %v1244_v54 = vmul.f32 %v3070_v25, %v2627_v16 }
 0x159   : > { %v1008_v1 = vadd.f32 %v976_v3, %v908_v26  ;;  %v1647_v15 = vadd.f32 %v2680_v31, %v1608_v55  ;;  %v1009_v56 = vadd.f32 %v977_v38, %v909_v18  ;;  %v1245_v37 = vmul.f32 %v3072_v51, %v2627_v16 }
 0x15a   : > { %v1176_v19 = vadd.f32 %v1144_v42, %v1076_v27  ;;  %v1678_v40 = vmax.f32 %v1646_v34, 0.0  ;;  %v1177_v21 = vadd.f32 %v1145_v8, %v1077_v12  ;;  %v1345_v52 = vmul.f32 %v2620_v9, %v3105_v47  ;;  %v3154_v27 = vld [vmem:[#allocation2 + $0x167] sm:$0xff]  ;;  %v3166_v42 = vld [vmem:[#allocation2 + $0x170] sm:$0xff] }
 0x15b   : > { %v1346_v43 = vmul.f32 %v2620_v9, %v3107_v61  ;;  %v1679_v46 = vmax.f32 %v1647_v15, 0.0  ;;  %v1413_v6 = vmul.f32 %v2622_v10, %v3114_v48  ;;  %v1414_v7 = vmul.f32 %v2622_v10, %v3116_v36  ;;  %v3164_v12 = vld [vmem:[#allocation2 + $0x168] sm:$0xff] }
 0x15c   : > { %v1276_v59 = vadd.f32 %v1244_v54, %v1176_v19  ;;  %v1710_v23 = vmin.f32 %v1678_v40, 6.0  ;;  %v1277_v62 = vadd.f32 %v1245_v37, %v1177_v21  ;;  %v1513_v49 = vmul.f32 %v2629_v17, %v3121_v28  ;;  %v3172_v15 = vld [vmem:[#allocation2 + $0x169] sm:$0xff] }
 0x15d   : > { %v1514_v29 = vmul.f32 %v2629_v17, %v3123_v20  ;;  %v1711_v2 = vmin.f32 %v1679_v46, 6.0  ;;  %v1445_v41 = vadd.f32 %v1413_v6, %v1345_v52  ;;  %v1446_v30 = vadd.f32 %v1414_v7, %v1346_v43 }
 0x15e   : > { %v1577_v50 = vadd.f32 %v1276_v59, %v1008_v1  ;;  %v1578_v5 = vadd.f32 %v1277_v62, %v1009_v56  ;;  %v810_v44 = vmul.f32 %v3056_v11, %v2590_v32  ;;  %v811_v58 = vmul.f32 %v3058_v53, %v2590_v32  ;;  %v3174_v56 = vld [vmem:[#allocation2 + $0x171] sm:$0xff] }
 0x15f   : > { %v878_v57 = vmul.f32 %v3060_v24, %v2592_v33  ;;  %v1735_v39 = vpack.c.bf16 %v1711_v2, %v1710_v23  ;;  %v1545_v4 = vadd.f32 %v1513_v49, %v1445_v41  ;;  %v1546_v63 = vadd.f32 %v1514_v29, %v1446_v30 }
 0x160   : > { %v879_v60 = vmul.f32 %v3067_v35, %v2592_v33  ;;  %v978_v3 = vmul.f32 %v3070_v25, %v2597_v45  ;;  %v979_v14 = vmul.f32 %v3072_v51, %v2597_v45  ;;  %v1078_v11 = vmul.f32 %v3105_v47, %v2613_v0  ;;  %v3156_v35 = vld [vmem:[#allocation2 + $0x16f] sm:$0xff] }
 0x161   : > { %v910_v22 = vadd.f32 %v878_v57, %v810_v44  ;;  %2390 = vmatmul.mubr.msk.bf16.gmra.mrb[12].mxu1 %vm678_vm2, %v1735_v39  ;;  %v1609_v53 = vadd.f32 %v1577_v50, %v1545_v4  ;;  %v1610_v24 = vadd.f32 %v1578_v5, %v1546_v63  ;;  %v1079_v38 = vmul.f32 %v3107_v61, %v2613_v0 }
 0x162   : > { %v911_v26 = vadd.f32 %v879_v60, %v811_v58  ;;  %v1146_v25 = vmul.f32 %v3114_v48, %v2625_v13  ;;  %v1147_v51 = vmul.f32 %v3116_v36, %v2625_v13  ;;  %v1246_v18 = vmul.f32 %v3121_v28, %v2627_v16 }
 0x163   : > { %v1010_v55 = vadd.f32 %v978_v3, %v910_v22  ;;  %v1648_v34 = vadd.f32 %v2680_v31, %v1609_v53  ;;  %v1649_v1 = vadd.f32 %v2680_v31, %v1610_v24  ;;  %v1247_v54 = vmul.f32 %v3123_v20, %v2627_v16  ;;  %v3213_v53 = vld [vmem:[#allocation2 + $0x18f] sm:$0xff] }
 0x164   : > { %v1011_v8 = vadd.f32 %v979_v14, %v911_v26  ;;  %v1178_v19 = vadd.f32 %v1146_v25, %v1078_v11  ;;  %v1179_v37 = vadd.f32 %v1147_v51, %v1079_v38  ;;  %v1347_v40 = vmul.f32 %v2620_v9, %v3154_v27  ;;  %v3205_v14 = vld [vmem:[#allocation2 + $0x187] sm:$0xff]  ;;  %v3220_v26 = vld [vmem:[%s3591_s4] ss:$0 sm:$0xff] }
 0x165   : > { %v1348_v21 = vmul.f32 %v2620_v9, %v3156_v35  ;;  %v1680_v52 = vmax.f32 %v1648_v34, 0.0  ;;  %v1681_v43 = vmax.f32 %v1649_v1, 0.0  ;;  %v1415_v31 = vmul.f32 %v2622_v10, %v3164_v12  ;;  %v3215_v24 = vld [vmem:[#allocation2 + $0x188] sm:$0xff] }
 0x166   : > { %v1416_v46 = vmul.f32 %v2622_v10, %v3166_v42  ;;  %v1278_v59 = vadd.f32 %v1246_v18, %v1178_v19  ;;  %v1279_v6 = vadd.f32 %v1247_v54, %v1179_v37  ;;  %v1515_v7 = vmul.f32 %v2629_v17, %v3172_v15  ;;  %v3226_v18 = vld [vmem:[#allocation2 + $0x190] sm:$0xff] }
 0x167   : > { %v1516_v23 = vmul.f32 %v2629_v17, %v3174_v56  ;;  %v1712_v62 = vmin.f32 %v1680_v52, 6.0  ;;  %v1713_v49 = vmin.f32 %v1681_v43, 6.0  ;;  %v1447_v29 = vadd.f32 %v1415_v31, %v1347_v40  ;;  %v3228_v34 = vld [vmem:[#allocation2 + $0x189] sm:$0xff]  ;;  %v3232_v37 = vld [vmem:[#allocation2 + $0x191] sm:$0xff] }
 0x168   : > { %v1448_v2 = vadd.f32 %v1416_v46, %v1348_v21  ;;  %v1579_v41 = vadd.f32 %v1278_v59, %v1010_v55  ;;  %v1580_v30 = vadd.f32 %v1279_v6, %v1011_v8  ;;  %v812_v50 = vmul.f32 %v3105_v47, %v2590_v32 }
 0x169   : > { %v813_v5 = vmul.f32 %v3107_v61, %v2590_v32  ;;  %v1736_v44 = vpack.c.bf16 %v1713_v49, %v1712_v62  ;;  %v1547_v58 = vadd.f32 %v1515_v7, %v1447_v29  ;;  %v880_v39 = vmul.f32 %v3114_v48, %v2592_v33 }
 0x16a   : > { %v1548_v57 = vadd.f32 %v1516_v23, %v1448_v2  ;;  %v881_v4 = vmul.f32 %v3116_v36, %v2592_v33  ;;  %v980_v63 = vmul.f32 %v3121_v28, %v2597_v45  ;;  %v981_v60 = vmul.f32 %v3123_v20, %v2597_v45 }
 0x16b   : > { %v1080_v47 = vmul.f32 %v3154_v27, %v2613_v0  ;;  %2393 = vmatprep.mubr.msk.bf16.mxu1 %vm678_vm2, %v1736_v44  ;;  %v1611_v61 = vadd.f32 %v1579_v41, %v1547_v58  ;;  %v912_v3 = vadd.f32 %v880_v39, %v812_v50  ;;  %v1081_v48 = vmul.f32 %v3156_v35, %v2613_v0 }
 0x16c   : > { %v1612_v22 = vadd.f32 %v1580_v30, %v1548_v57  ;;  %v913_v36 = vadd.f32 %v881_v4, %v813_v5  ;;  %v1148_v28 = vmul.f32 %v3164_v12, %v2625_v13  ;;  %v1149_v20 = vmul.f32 %v3166_v42, %v2625_v13 }
 0x16d   : > { %v1248_v11 = vmul.f32 %v3172_v15, %v2627_v16  ;;  %v1650_v38 = vadd.f32 %v3220_v26, %v1611_v61  ;;  %v1012_v25 = vadd.f32 %v980_v63, %v912_v3  ;;  %v1249_v51 = vmul.f32 %v3174_v56, %v2627_v16  ;;  %v3269_v3 = vld [vmem:[#allocation2 + $0x1a8] sm:$0xff] }
 0x16e   : > { %v1651_v55 = vadd.f32 %v3220_v26, %v1612_v22  ;;  %v1013_v1 = vadd.f32 %v981_v60, %v913_v36  ;;  %v1180_v8 = vadd.f32 %v1148_v28, %v1080_v47  ;;  %v1181_v54 = vadd.f32 %v1149_v20, %v1081_v48  ;;  %v3265_v22 = vld [vmem:[#allocation2 + $0x1a7] sm:$0xff] }
 0x16f   : > { %v1349_v19 = vmul.f32 %v2620_v9, %v3205_v14  ;;  %v1682_v40 = vmax.f32 %v1650_v38, 0.0  ;;  %v1350_v52 = vmul.f32 %v2620_v9, %v3213_v53  ;;  %v1417_v43 = vmul.f32 %v2622_v10, %v3215_v24 }
 0x170   : > { %v1683_v21 = vmax.f32 %v1651_v55, 0.0  ;;  %v1280_v31 = vadd.f32 %v1248_v11, %v1180_v8  ;;  %v1281_v46 = vadd.f32 %v1249_v51, %v1181_v54  ;;  %v1418_v59 = vmul.f32 %v2622_v10, %v3226_v18  ;;  %v3276_v11 = vld [vmem:[#allocation2 + $0x1b0] sm:$0xff] }
 0x171   : > { %v1517_v6 = vmul.f32 %v2629_v17, %v3228_v34  ;;  %v1714_v7 = vmin.f32 %v1682_v40, 6.0  ;;  %v1449_v62 = vadd.f32 %v1417_v43, %v1349_v19  ;;  %v1518_v49 = vmul.f32 %v2629_v17, %v3232_v37  ;;  %v3281_v8 = vld [vmem:[#allocation2 + $0x1b1] sm:$0xff] }
 0x172   : > { %v1715_v23 = vmin.f32 %v1683_v21, 6.0  ;;  %v1450_v29 = vadd.f32 %v1418_v59, %v1350_v52  ;;  %v1581_v2 = vadd.f32 %v1280_v31, %v1012_v25  ;;  %v1582_v41 = vadd.f32 %v1281_v46, %v1013_v1  ;;  %v3279_v1 = vld [vmem:[#allocation2 + $0x1a9] sm:$0xff] }
 0x173   : > { %v814_v30 = vmul.f32 %v3154_v27, %v2590_v32  ;;  %v1549_v5 = vadd.f32 %v1517_v6, %v1449_v62  ;;  %v815_v44 = vmul.f32 %v3156_v35, %v2590_v32  ;;  %v882_v58 = vmul.f32 %v3164_v12, %v2592_v33 }
 0x174   : > { %v1737_v50 = vpack.c.bf16 %v1715_v23, %v1714_v7  ;;  %v1550_v57 = vadd.f32 %v1518_v49, %v1450_v29  ;;  %v883_v39 = vmul.f32 %v3166_v42, %v2592_v33  ;;  %v982_v4 = vmul.f32 %v3172_v15, %v2597_v45 }
 0x175   : > { %v983_v63 = vmul.f32 %v3174_v56, %v2597_v45  ;;  %v1613_v27 = vadd.f32 %v1581_v2, %v1549_v5  ;;  %v914_v60 = vadd.f32 %v882_v58, %v814_v30  ;;  %v1082_v35 = vmul.f32 %v3205_v14, %v2613_v0  ;;  %v3267_v56 = vld [vmem:[#allocation2 + $0x1af] sm:$0xff] }
 0x176   : > { %2394 = vmatmul.mubr.msk.bf16.gmra.mrb[16].mxu1 %vm678_vm2, %v1737_v50  ;;  %v1083_v12 = vmul.f32 %v3213_v53, %v2613_v0  ;;  %v1614_v47 = vadd.f32 %v1582_v41, %v1550_v57  ;;  %v915_v61 = vadd.f32 %v883_v39, %v815_v44  ;;  %v1150_v42 = vmul.f32 %v3215_v24, %v2625_v13 }
 0x177   : > { %v1151_v15 = vmul.f32 %v3226_v18, %v2625_v13  ;;  %v1652_v48 = vadd.f32 %v3220_v26, %v1613_v27  ;;  %v1014_v36 = vadd.f32 %v982_v4, %v914_v60  ;;  %v1250_v28 = vmul.f32 %v3228_v34, %v2627_v16 }
 0x178   : > { %v1251_v20 = vmul.f32 %v3232_v37, %v2627_v16  ;;  %v1653_v38 = vadd.f32 %v3220_v26, %v1614_v47  ;;  %v1015_v55 = vadd.f32 %v983_v63, %v915_v61  ;;  %v1182_v25 = vadd.f32 %v1150_v42, %v1082_v35  ;;  %v3314_v35 = vld [vmem:[#allocation2 + $0x1c7] sm:$0xff] }
 0x179   : > { %v1183_v51 = vadd.f32 %v1151_v15, %v1083_v12  ;;  %v1684_v54 = vmax.f32 %v1652_v48, 0.0  ;;  %v1351_v19 = vmul.f32 %v2620_v9, %v3265_v22  ;;  %v1352_v40 = vmul.f32 %v2620_v9, %v3267_v56  ;;  %v3323_v42 = vld [vmem:[#allocation2 + $0x1c8] sm:$0xff]  ;;  %v3325_v15 = vld [vmem:[#allocation2 + $0x1d0] sm:$0xff] }
 0x17a   : > { %v1419_v21 = vmul.f32 %v2622_v10, %v3269_v3  ;;  %v1685_v52 = vmax.f32 %v1653_v38, 0.0  ;;  %v1282_v43 = vadd.f32 %v1250_v28, %v1182_v25  ;;  %v1420_v46 = vmul.f32 %v2622_v10, %v3276_v11  ;;  %v3330_v38 = vld [vmem:[#allocation2 + $0x1c9] sm:$0xff] }
 0x17b   : > { %v1283_v31 = vadd.f32 %v1251_v20, %v1183_v51  ;;  %v1716_v59 = vmin.f32 %v1684_v54, 6.0  ;;  %v1519_v7 = vmul.f32 %v2629_v17, %v3279_v1  ;;  %v1520_v23 = vmul.f32 %v2629_v17, %v3281_v8 }
 0x17c   : > { %v1451_v6 = vadd.f32 %v1419_v21, %v1351_v19  ;;  %v1717_v62 = vmin.f32 %v1685_v52, 6.0  ;;  %v1452_v49 = vadd.f32 %v1420_v46, %v1352_v40  ;;  %v1583_v29 = vadd.f32 %v1282_v43, %v1014_v36 }
 0x17d   : > { %v1584_v2 = vadd.f32 %v1283_v31, %v1015_v55  ;;  %v816_v30 = vmul.f32 %v3205_v14, %v2590_v32  ;;  %v817_v50 = vmul.f32 %v3213_v53, %v2590_v32  ;;  %v884_v5 = vmul.f32 %v3215_v24, %v2592_v33  ;;  %v3332_v55 = vld [vmem:[#allocation2 + $0x1d1] sm:$0xff] }
 0x17e   : > { %v1551_v41 = vadd.f32 %v1519_v7, %v1451_v6  ;;  %v1738_v44 = vpack.c.bf16 %v1717_v62, %v1716_v59  ;;  %v1552_v58 = vadd.f32 %v1520_v23, %v1452_v49  ;;  %v885_v57 = vmul.f32 %v3226_v18, %v2592_v33 }
 0x17f   : > { %v984_v39 = vmul.f32 %v3228_v34, %v2597_v45  ;;  %v916_v63 = vadd.f32 %v884_v5, %v816_v30  ;;  %v985_v27 = vmul.f32 %v3232_v37, %v2597_v45  ;;  %v1084_v14 = vmul.f32 %v3265_v22, %v2613_v0  ;;  %v3316_v34 = vld [vmem:[#allocation2 + $0x1cf] sm:$0xff] }
 0x180   : > { %v1615_v4 = vadd.f32 %v1583_v29, %v1551_v41  ;;  %2397 = vmatprep.mubr.msk.bf16.mxu1 %vm678_vm2, %v1738_v44  ;;  %v1616_v53 = vadd.f32 %v1584_v2, %v1552_v58  ;;  %v917_v24 = vadd.f32 %v885_v57, %v817_v50  ;;  %v1085_v60 = vmul.f32 %v3267_v56, %v2613_v0 }
 0x181   : > { %v1152_v18 = vmul.f32 %v3269_v3, %v2625_v13  ;;  %v1016_v37 = vadd.f32 %v984_v39, %v916_v63  ;;  %v1153_v47 = vmul.f32 %v3276_v11, %v2625_v13  ;;  %v1252_v61 = vmul.f32 %v3279_v1, %v2627_v16 }
 0x182   : > { %v1654_v12 = vadd.f32 %v3220_v26, %v1615_v4  ;;  %v1655_v48 = vadd.f32 %v3220_v26, %v1616_v53  ;;  %v1017_v36 = vadd.f32 %v985_v27, %v917_v24  ;;  %v1253_v20 = vmul.f32 %v3281_v8, %v2627_v16 }
 0x183   : > { %v1184_v28 = vadd.f32 %v1152_v18, %v1084_v14  ;;  %v1185_v51 = vadd.f32 %v1153_v47, %v1085_v60  ;;  %v1353_v54 = vmul.f32 %v2620_v9, %v3314_v35  ;;  %v1354_v19 = vmul.f32 %v2620_v9, %v3316_v34  ;;  %v3363_v14 = vld [vmem:[#allocation2 + $0x1e7] sm:$0xff]  ;;  %v3375_v18 = vld [vmem:[#allocation2 + $0x1f0] sm:$0xff] }
 0x184   : > { %v1686_v25 = vmax.f32 %v1654_v12, 0.0  ;;  %v1687_v40 = vmax.f32 %v1655_v48, 0.0  ;;  %v1421_v52 = vmul.f32 %v2622_v10, %v3323_v42  ;;  %v1422_v43 = vmul.f32 %v2622_v10, %v3325_v15  ;;  %v3373_v60 = vld [vmem:[#allocation2 + $0x1e8] sm:$0xff] }
 0x185   : > { %v1284_v21 = vadd.f32 %v1252_v61, %v1184_v28  ;;  %v1285_v46 = vadd.f32 %v1253_v20, %v1185_v51  ;;  %v1521_v59 = vmul.f32 %v2629_v17, %v3330_v38  ;;  %v1522_v6 = vmul.f32 %v2629_v17, %v3332_v55  ;;  %v3381_v48 = vld [vmem:[#allocation2 + $0x1e9] sm:$0xff] }
 0x186   : > { %v1718_v31 = vmin.f32 %v1686_v25, 6.0  ;;  %v1719_v7 = vmin.f32 %v1687_v40, 6.0  ;;  %v1453_v23 = vadd.f32 %v1421_v52, %v1353_v54  ;;  %v1454_v62 = vadd.f32 %v1422_v43, %v1354_v19 }
 0x187   : > { %v1585_v49 = vadd.f32 %v1284_v21, %v1016_v37  ;;  %v1586_v29 = vadd.f32 %v1285_v46, %v1017_v36  ;;  %v818_v2 = vmul.f32 %v3265_v22, %v2590_v32  ;;  %v819_v41 = vmul.f32 %v3267_v56, %v2590_v32  ;;  %v3383_v36 = vld [vmem:[#allocation2 + $0x1f1] sm:$0xff] }
 0x188   : > { %v886_v30 = vmul.f32 %v3269_v3, %v2592_v33  ;;  %v1739_v50 = vpack.c.bf16 %v1719_v7, %v1718_v31  ;;  %v1553_v5 = vadd.f32 %v1521_v59, %v1453_v23  ;;  %v1554_v44 = vadd.f32 %v1522_v6, %v1454_v62 }
 0x189   : > { %v887_v58 = vmul.f32 %v3276_v11, %v2592_v33  ;;  %v986_v39 = vmul.f32 %v3279_v1, %v2597_v45  ;;  %v987_v4 = vmul.f32 %v3281_v8, %v2597_v45  ;;  %v1086_v22 = vmul.f32 %v3314_v35, %v2613_v0  ;;  %v3365_v11 = vld [vmem:[#allocation2 + $0x1ef] sm:$0xff] }
 0x18a   : > { %v918_v57 = vadd.f32 %v886_v30, %v818_v2  ;;  %2398 = vmatmul.mubr.msk.bf16.gmra.mrb[20].mxu1 %vm678_vm2, %v1739_v50  ;;  %v1617_v56 = vadd.f32 %v1585_v49, %v1553_v5  ;;  %v1618_v3 = vadd.f32 %v1586_v29, %v1554_v44  ;;  %v1087_v27 = vmul.f32 %v3316_v34, %v2613_v0 }
 0x18b   : > { %v919_v63 = vadd.f32 %v887_v58, %v819_v41  ;;  %v1154_v1 = vmul.f32 %v3323_v42, %v2625_v13  ;;  %v1155_v8 = vmul.f32 %v3325_v15, %v2625_v13  ;;  %v1254_v24 = vmul.f32 %v3330_v38, %v2627_v16 }
 0x18c   : > { %v1018_v53 = vadd.f32 %v986_v39, %v918_v57  ;;  %v1656_v12 = vadd.f32 %v3220_v26, %v1617_v56  ;;  %v1657_v37 = vadd.f32 %v3220_v26, %v1618_v3  ;;  %v1255_v61 = vmul.f32 %v3332_v55, %v2627_v16  ;;  %v1322_v3 = vld [vmem:[#allocation2 + $0x20f] sm:$0xff] }
 0x18d   : > { %v1019_v47 = vadd.f32 %v987_v4, %v919_v63  ;;  %v1186_v28 = vadd.f32 %v1154_v1, %v1086_v22  ;;  %v1187_v20 = vadd.f32 %v1155_v8, %v1087_v27  ;;  %v1355_v25 = vmul.f32 %v2620_v9, %v3363_v14  ;;  %v1321_v22 = vld [vmem:[#allocation2 + $0x207] sm:$0xff] }
 0x18e   : > { %v1356_v51 = vmul.f32 %v2620_v9, %v3365_v11  ;;  %v1688_v54 = vmax.f32 %v1656_v12, 0.0  ;;  %v1689_v19 = vmax.f32 %v1657_v37, 0.0  ;;  %v1423_v40 = vmul.f32 %v2622_v10, %v3373_v60  ;;  %v1389_v63 = vld [vmem:[#allocation2 + $0x208] sm:$0xff] }
 0x18f   : > { %v1424_v21 = vmul.f32 %v2622_v10, %v3375_v18  ;;  %v1286_v52 = vadd.f32 %v1254_v24, %v1186_v28  ;;  %v1287_v43 = vadd.f32 %v1255_v61, %v1187_v20  ;;  %v1523_v31 = vmul.f32 %v2629_v17, %v3381_v48  ;;  %v1390_v24 = vld [vmem:[#allocation2 + $0x210] sm:$0xff] }
 0x190   : > { %v1524_v46 = vmul.f32 %v2629_v17, %v3383_v36  ;;  %v1720_v59 = vmin.f32 %v1688_v54, 6.0  ;;  %v1721_v6 = vmin.f32 %v1689_v19, 6.0  ;;  %v1455_v7 = vadd.f32 %v1423_v40, %v1355_v25  ;;  %v1489_v12 = vld [vmem:[#allocation2 + $0x209] sm:$0xff]  ;;  %v1490_v20 = vld [vmem:[#allocation2 + $0x211] sm:$0xff] }
 0x191   : > { %v1456_v23 = vadd.f32 %v1424_v21, %v1356_v51  ;;  %v1587_v62 = vadd.f32 %v1286_v52, %v1018_v53  ;;  %v1588_v49 = vadd.f32 %v1287_v43, %v1019_v47  ;;  %v820_v29 = vmul.f32 %v3314_v35, %v2590_v32 }
 0x192   : > { %v821_v2 = vmul.f32 %v3316_v34, %v2590_v32  ;;  %v1740_v41 = vpack.c.bf16 %v1721_v6, %v1720_v59  ;;  %v1555_v30 = vadd.f32 %v1523_v31, %v1455_v7  ;;  %v888_v5 = vmul.f32 %v3323_v42, %v2592_v33 }
 0x193   : > { %v1556_v50 = vadd.f32 %v1524_v46, %v1456_v23  ;;  %v889_v44 = vmul.f32 %v3325_v15, %v2592_v33  ;;  %v988_v58 = vmul.f32 %v3330_v38, %v2597_v45  ;;  %v989_v57 = vmul.f32 %v3332_v55, %v2597_v45 }
 0x194   : > { %v1088_v35 = vmul.f32 %v3363_v14, %v2613_v0  ;;  %2401 = vmatprep.mubr.msk.bf16.mxu1 %vm678_vm2, %v1740_v41  ;;  %v1619_v34 = vadd.f32 %v1587_v62, %v1555_v30  ;;  %v920_v4 = vadd.f32 %v888_v5, %v820_v29  ;;  %v1089_v42 = vmul.f32 %v3365_v11, %v2613_v0 }
 0x195   : > { %v1620_v39 = vadd.f32 %v1588_v49, %v1556_v50  ;;  %v921_v56 = vadd.f32 %v889_v44, %v821_v2  ;;  %v1156_v15 = vmul.f32 %v3373_v60, %v2625_v13  ;;  %v1157_v38 = vmul.f32 %v3375_v18, %v2625_v13 }
 0x196   : > { %v1256_v55 = vmul.f32 %v3381_v48, %v2627_v16  ;;  %v1658_v27 = vadd.f32 %v3220_v26, %v1619_v34  ;;  %v1020_v1 = vadd.f32 %v988_v58, %v920_v4  ;;  %v1257_v8 = vmul.f32 %v3383_v36, %v2627_v16 }
 0x197   : > { %v1659_v53 = vadd.f32 %v3220_v26, %v1620_v39  ;;  %v1021_v37 = vadd.f32 %v989_v57, %v921_v56  ;;  %v1188_v47 = vadd.f32 %v1156_v15, %v1088_v35  ;;  %v1189_v61 = vadd.f32 %v1157_v38, %v1089_v42  ;;  %v1324_v39 = vld [vmem:[#allocation2 + $0x22f] sm:$0xff] }
 0x198   : > { %v1357_v28 = vmul.f32 %v2620_v9, %v1321_v22  ;;  %v1690_v25 = vmax.f32 %v1658_v27, 0.0  ;;  %v1358_v54 = vmul.f32 %v2620_v9, %v1322_v3  ;;  %v1425_v19 = vmul.f32 %v2622_v10, %v1389_v63  ;;  %v1392_v56 = vld [vmem:[#allocation2 + $0x230] sm:$0xff] }
 0x199   : > { %v1691_v51 = vmax.f32 %v1659_v53, 0.0  ;;  %v1288_v40 = vadd.f32 %v1256_v55, %v1188_v47  ;;  %v1289_v21 = vadd.f32 %v1257_v8, %v1189_v61  ;;  %v1426_v52 = vmul.f32 %v2622_v10, %v1390_v24  ;;  %v1491_v55 = vld [vmem:[#allocation2 + $0x229] sm:$0xff] }
 0x19a   : > { %v1525_v43 = vmul.f32 %v2629_v17, %v1489_v12  ;;  %v1722_v31 = vmin.f32 %v1690_v25, 6.0  ;;  %v1457_v59 = vadd.f32 %v1425_v19, %v1357_v28  ;;  %v1526_v6 = vmul.f32 %v2629_v17, %v1490_v20 }
 0x19b   : > { %v1723_v46 = vmin.f32 %v1691_v51, 6.0  ;;  %v1458_v7 = vadd.f32 %v1426_v52, %v1358_v54  ;;  %v1589_v23 = vadd.f32 %v1288_v40, %v1020_v1  ;;  %v1590_v62 = vadd.f32 %v1289_v21, %v1021_v37 }
 0x19c   : > { %v822_v49 = vmul.f32 %v3363_v14, %v2590_v32  ;;  %v1557_v2 = vadd.f32 %v1525_v43, %v1457_v59  ;;  %v823_v41 = vmul.f32 %v3365_v11, %v2590_v32  ;;  %v890_v30 = vmul.f32 %v3373_v60, %v2592_v33 }
 0x19d   : > { %v1741_v29 = vpack.c.bf16 %v1723_v46, %v1722_v31  ;;  %v1558_v50 = vadd.f32 %v1526_v6, %v1458_v7  ;;  %v891_v5 = vmul.f32 %v3375_v18, %v2592_v33  ;;  %v990_v44 = vmul.f32 %v3381_v48, %v2597_v45  ;;  %v1323_v18 = vld [vmem:[#allocation2 + $0x227] sm:$0xff] }
 0x19e   : > { %v991_v58 = vmul.f32 %v3383_v36, %v2597_v45  ;;  %v1621_v14 = vadd.f32 %v1589_v23, %v1557_v2  ;;  %v922_v57 = vadd.f32 %v890_v30, %v822_v49  ;;  %v1090_v35 = vmul.f32 %v1321_v22, %v2613_v0  ;;  %v1391_v48 = vld [vmem:[#allocation2 + $0x228] sm:$0xff]  ;;  %v2226_v7 = vld [vmem:[%s2505_s8] sm:$0xff]  }
 0x19f   : > { %2402 = vmatmul.mubr.msk.bf16.gmra.mrb[24].mxu1 %vm678_vm2, %v1741_v29  ;;  %v1091_v32 = vmul.f32 %v1322_v3, %v2613_v0  ;;  %v1622_v11 = vadd.f32 %v1590_v62, %v1558_v50  ;;  %v923_v60 = vadd.f32 %v891_v5, %v823_v41  ;;  %v1158_v34 = vmul.f32 %v1389_v63, %v2625_v13  ;;  %v1492_v3 = vld [vmem:[#allocation2 + $0x231] sm:$0xff]  ;;  %v2289_v6 = vld [vmem:[%s2505_s8 + $0x8] sm:$0xff]   ;;  %v3466_v23 = vld [vmem:[%s3593_s6] ss:$0 sm:$0xff] }
 0x1a0   : > { %v1159_v33 = vmul.f32 %v1390_v24, %v2625_v13  ;;  %v1660_v4 = vadd.f32 %v3220_v26, %v1621_v14  ;;  %v1022_v45 = vadd.f32 %v990_v44, %v922_v57  ;;  %v1258_v36 = vmul.f32 %v1489_v12, %v2627_v16 }
 0x1a1   : > { %v1259_v42 = vmul.f32 %v1490_v20, %v2627_v16  ;;  %v1661_v22 = vadd.f32 %v3220_v26, %v1622_v11  ;;  %v1023_v0 = vadd.f32 %v991_v58, %v923_v60  ;;  %v1190_v15 = vadd.f32 %v1158_v34, %v1090_v35  ;;  %v2291_v60 = vld [vmem:[%s2505_s8 + $0x18] sm:$0xff]   ;;  %v2290_v34 = vld [vmem:[%s2505_s8 + $0x10] sm:$0xff]  }
 0x1a2   : > { %v1191_v38 = vadd.f32 %v1159_v33, %v1091_v32  ;;  %v1692_v63 = vmax.f32 %v1660_v4, 0.0  ;;  %v1359_v13 = vmul.f32 %v2620_v9, %v1323_v18  ;;  %v1360_v27 = vmul.f32 %v2620_v9, %v1324_v39 }
 0x1a3   : > { %v1427_v53 = vmul.f32 %v2622_v10, %v1391_v48  ;;  %v1693_v1 = vmax.f32 %v1661_v22, 0.0  ;;  %v1290_v8 = vadd.f32 %v1258_v36, %v1190_v15  ;;  %v1428_v16 = vmul.f32 %v2622_v10, %v1392_v56 }
 0x1a4   : > { %v1291_v24 = vadd.f32 %v1259_v42, %v1191_v38  ;;  %v1724_v12 = vmin.f32 %v1692_v63, 6.0  ;;  %v1527_v47 = vmul.f32 %v2629_v17, %v1491_v55  ;;  %v1528_v61 = vmul.f32 %v2629_v17, %v1492_v3 }
 0x1a5   : > { %v1459_v37 = vadd.f32 %v1427_v53, %v1359_v13  ;;  %v1725_v28 = vmin.f32 %v1693_v1, 6.0  ;;  %v1460_v20 = vadd.f32 %v1428_v16, %v1360_v27  ;;  %v1591_v25 = vadd.f32 %v1290_v8, %v1022_v45  ;;  %v2293_v13 = vld [vmem:[%s2505_s8 + $0x28] sm:$0xff]   ;;  %v2292_v27 = vld [vmem:[%s2505_s8 + $0x20] sm:$0xff]  }
 0x1a6   : > { %v1592_v51 = vadd.f32 %v1291_v24, %v1023_v0  ;;  %v2231_v62 = vunpack.c.l.bf16 %v2289_v6  ;;  %v2227_v29 = vunpack.c.l.bf16 %v2226_v7  ;;  %v2232_v41 = vunpack.c.h.bf16 %v2289_v6 }
 0x1a7   : > { %v1559_v9 = vadd.f32 %v1527_v47, %v1459_v37  ;;  %v1742_v54 = vpack.c.bf16 %v1725_v28, %v1724_v12  ;;  %v1560_v19 = vadd.f32 %v1528_v61, %v1460_v20  ;;  %v2228_v5 = vunpack.c.h.bf16 %v2226_v7 }
 0x1a8   : > { %v2239_v33 = vunpack.c.l.bf16 %v2291_v60  ;;  %v2235_v39 = vunpack.c.l.bf16 %v2290_v34  ;;  %v2240_v45 = vunpack.c.h.bf16 %v2291_v60  ;;  %v2236_v56 = vunpack.c.h.bf16 %v2290_v34 }
 0x1a9   : > { %v1623_v40 = vadd.f32 %v1591_v25, %v1559_v9  ;;  %2405 = vmatprep.mubr.msk.bf16.mxu1 %vm678_vm2, %v1742_v54  ;;  %v1624_v10 = vadd.f32 %v1592_v51, %v1560_v19  ;;  %v2247_v53 = vunpack.c.l.bf16 %v2293_v13  ;;  %v2243_v8 = vunpack.c.l.bf16 %v2292_v27 }
 0x1aa   : > { %v2248_v12 = vunpack.c.h.bf16 %v2293_v13  ;;  %v2244_v61 = vunpack.c.h.bf16 %v2292_v27 }
 0x1ab   : > { %v1662_v21 = vadd.f32 %v3220_v26, %v1623_v40  ;;  %v1663_v52 = vadd.f32 %v3220_v26, %v1624_v10  ;;  %v2295_v40 = vld [vmem:[%s2505_s8 + $0x38] sm:$0xff]   ;;  %v2294_v10 = vld [vmem:[%s2505_s8 + $0x30] sm:$0xff]  }
 0x1ac   : > { %v2252_v7 = vunpack.c.h.bf16 %v2294_v10 }
 0x1ad   : > { %v1694_v43 = vmax.f32 %v1662_v21, 0.0  ;;  %v1695_v17 = vmax.f32 %v1663_v52, 0.0  ;;  %v2255_v21 = vunpack.c.l.bf16 %v2295_v40 }
 0x1af   : > { %v1726_v31 = vmin.f32 %v1694_v43, 6.0  ;;  %v1727_v46 = vmin.f32 %v1695_v17, 6.0  ;;  %v2251_v43 = vunpack.c.l.bf16 %v2294_v10 }
 0x1b1   : > { %v1743_v59 = vpack.c.bf16 %v1727_v46, %v1726_v31  ;;  %v2256_v46 = vunpack.c.h.bf16 %v2295_v40 }
 0x1b3   : > { %2406 = vmatmul.mubr.msk.bf16.gmra.mrb[28].mxu1 %vm678_vm2, %v1743_v59 }
 0x1ed   : > { %v2379_v49 = vpop.f32.mrb[0].mxu1 }
 0x1ee   : > { %v1858_v26 = vadd.f32 %v2379_v49, %v3466_v23  ;;  %v1849_v2 = vpop.f32.mrb[1].mxu1 }
 0x1ef   : > { %v1850_v30 = vadd.f32 %v3466_v23, %v1849_v2  ;;  %v2380_v50 = vpop.f32.mrb[2].mxu1 }
 0x1f0   : > { %v2042_v44 = vadd.f32 %v2231_v62, %v1858_v26  ;;  %v1861_v58 = vadd.f32 %v2380_v50, %v3466_v23  ;;  %v1852_v14 = vpop.f32.mrb[3].mxu1  ;;  %v2297_v50 = vld [vmem:[%s2505_s8 + $0x48] sm:$0xff]  }
 0x1f1   : > { %v2040_v57 = vadd.f32 %v2227_v29, %v1850_v30  ;;  %v1853_v35 = vadd.f32 %v3466_v23, %v1852_v14 }
 0x1f2   : > { %2074 = vst.msk [vmem:[%s3473_s10 + $0x10] sm:$0xff] %vm400_vm1, %v2042_v44  ;;  %v2043_v32 = vadd.f32 %v2232_v41, %v1861_v58  ;;  %v2263_v44 = vunpack.c.l.bf16 %v2297_v50 }
 0x1f3   : > { %2072 = vst.msk [vmem:[%s3473_s10] sm:$0xff] %vm400_vm1, %v2040_v57  ;;  %v2041_v11 = vadd.f32 %v2228_v5, %v1853_v35  ;;  %v2296_v5 = vld [vmem:[%s2505_s8 + $0x40] sm:$0xff]  }
 0x1f4   : > { %2075 = vst.msk [vmem:[%s3473_s10 + $0x18] sm:$0xff] %vm400_vm1, %v2043_v32  ;;  %v2259_v14 = vunpack.c.l.bf16 %v2296_v5  ;;  %v2264_v32 = vunpack.c.h.bf16 %v2297_v50  ;;  %v2260_v34 = vunpack.c.h.bf16 %v2296_v5 }
 0x1f5   : > { %2073 = vst.msk [vmem:[%s3473_s10 + $0x8] sm:$0xff] %vm400_vm1, %v2041_v11 }
 0x208   : > { %v2383_v18 = vpop.f32.mrb[4].mxu1 }
 0x209   : > { %v1874_v48 = vadd.f32 %v2383_v18, %v3466_v23  ;;  %v1865_v4 = vpop.f32.mrb[5].mxu1 }
 0x20a   : > { %v1866_v36 = vadd.f32 %v3466_v23, %v1865_v4  ;;  %v2384_v42 = vpop.f32.mrb[6].mxu1 }
 0x20b   : > { %v2046_v22 = vadd.f32 %v2239_v33, %v1874_v48  ;;  %v1877_v0 = vadd.f32 %v2384_v42, %v3466_v23  ;;  %v1868_v15 = vpop.f32.mrb[7].mxu1  ;;  %v2299_v42 = vld [vmem:[%s2505_s8 + $0x58] sm:$0xff]  }
 0x20c   : > { %v2044_v38 = vadd.f32 %v2235_v39, %v1866_v36  ;;  %v1869_v55 = vadd.f32 %v3466_v23, %v1868_v15 }
 0x20d   : > { %2078 = vst.msk [vmem:[%s3473_s10 + $0x30] sm:$0xff] %vm400_vm1, %v2046_v22  ;;  %v2047_v3 = vadd.f32 %v2240_v45, %v1877_v0  ;;  %v2271_v22 = vunpack.c.l.bf16 %v2299_v42 }
 0x20e   : > { %2076 = vst.msk [vmem:[%s3473_s10 + $0x20] sm:$0xff] %vm400_vm1, %v2044_v38  ;;  %v2045_v63 = vadd.f32 %v2236_v56, %v1869_v55  ;;  %v2298_v56 = vld [vmem:[%s2505_s8 + $0x50] sm:$0xff]  }
 0x20f   : > { %2079 = vst.msk [vmem:[%s3473_s10 + $0x38] sm:$0xff] %vm400_vm1, %v2047_v3  ;;  %v2267_v15 = vunpack.c.l.bf16 %v2298_v56  ;;  %v2272_v3 = vunpack.c.h.bf16 %v2299_v42  ;;  %v2268_v27 = vunpack.c.h.bf16 %v2298_v56 }
 0x210   : > { %2077 = vst.msk [vmem:[%s3473_s10 + $0x28] sm:$0xff] %vm400_vm1, %v2045_v63 }
 0x21f   : > { %v2387_v1 = vpop.f32.mrb[8].mxu1 }
 0x220   : > { %v1890_v24 = vadd.f32 %v2387_v1, %v3466_v23  ;;  %v1881_v16 = vpop.f32.mrb[9].mxu1 }
 0x221   : > { %v1882_v37 = vadd.f32 %v3466_v23, %v1881_v16  ;;  %v2388_v47 = vpop.f32.mrb[10].mxu1 }
 0x222   : > { %v2050_v28 = vadd.f32 %v2247_v53, %v1890_v24  ;;  %v1893_v20 = vadd.f32 %v2388_v47, %v3466_v23  ;;  %v1884_v25 = vpop.f32.mrb[11].mxu1  ;;  %v2301_v47 = vld [vmem:[%s2505_s8 + $0x68] sm:$0xff]  }
 0x223   : > { %v2048_v51 = vadd.f32 %v2243_v8, %v1882_v37  ;;  %v1885_v9 = vadd.f32 %v3466_v23, %v1884_v25 }
 0x224   : > { %2082 = vst.msk [vmem:[%s3473_s10 + $0x50] sm:$0xff] %vm400_vm1, %v2050_v28  ;;  %v2051_v54 = vadd.f32 %v2248_v12, %v1893_v20  ;;  %v2279_v28 = vunpack.c.l.bf16 %v2301_v47 }
 0x225   : > { %2080 = vst.msk [vmem:[%s3473_s10 + $0x40] sm:$0xff] %vm400_vm1, %v2048_v51  ;;  %v2049_v19 = vadd.f32 %v2244_v61, %v1885_v9  ;;  %v2300_v61 = vld [vmem:[%s2505_s8 + $0x60] sm:$0xff]  }
 0x226   : > { %2083 = vst.msk [vmem:[%s3473_s10 + $0x58] sm:$0xff] %vm400_vm1, %v2051_v54  ;;  %v2275_v25 = vunpack.c.l.bf16 %v2300_v61  ;;  %v2280_v54 = vunpack.c.h.bf16 %v2301_v47  ;;  %v2276_v10 = vunpack.c.h.bf16 %v2300_v61 }
 0x227   : > { %2081 = vst.msk [vmem:[%s3473_s10 + $0x48] sm:$0xff] %vm400_vm1, %v2049_v19 }
 0x234   : > { %v2391_v52 = vpop.f32.mrb[12].mxu1 }
 0x235   : > { %v1906_v17 = vadd.f32 %v2391_v52, %v3466_v23  ;;  %v1897_v31 = vpop.f32.mrb[13].mxu1 }
 0x236   : > { %v1898_v59 = vadd.f32 %v3466_v23, %v1897_v31  ;;  %v2392_v6 = vpop.f32.mrb[14].mxu1 }
 0x237   : > { %v2054_v62 = vadd.f32 %v2255_v21, %v1906_v17  ;;  %v1909_v49 = vadd.f32 %v2392_v6, %v3466_v23  ;;  %v1900_v29 = vpop.f32.mrb[15].mxu1  ;;  %v2303_v6 = vld [vmem:[%s2505_s8 + $0x78] sm:$0xff]  }
 0x238   : > { %v2052_v26 = vadd.f32 %v2251_v43, %v1898_v59  ;;  %v1901_v2 = vadd.f32 %v3466_v23, %v1900_v29 }
 0x239   : > { %2086 = vst.msk [vmem:[%s3473_s10 + $0x70] sm:$0xff] %vm400_vm1, %v2054_v62  ;;  %v2055_v41 = vadd.f32 %v2256_v46, %v1909_v49  ;;  %v2287_v62 = vunpack.c.l.bf16 %v2303_v6 }
 0x23a   : > { %2084 = vst.msk [vmem:[%s3473_s10 + $0x60] sm:$0xff] %vm400_vm1, %v2052_v26  ;;  %v2053_v30 = vadd.f32 %v2252_v7, %v1901_v2  ;;  %v2302_v7 = vld [vmem:[%s2505_s8 + $0x70] sm:$0xff]  }
 0x23b   : > { %2087 = vst.msk [vmem:[%s3473_s10 + $0x78] sm:$0xff] %vm400_vm1, %v2055_v41  ;;  %v2283_v29 = vunpack.c.l.bf16 %v2302_v7  ;;  %v2288_v41 = vunpack.c.h.bf16 %v2303_v6  ;;  %v2284_v5 = vunpack.c.h.bf16 %v2302_v7 }
 0x23c   : > { %2085 = vst.msk [vmem:[%s3473_s10 + $0x68] sm:$0xff] %vm400_vm1, %v2053_v30 }
 0x249   : > { %v2395_v58 = vpop.f32.mrb[16].mxu1 }
 0x24a   : > { %v1922_v57 = vadd.f32 %v2395_v58, %v3466_v23  ;;  %v1913_v35 = vpop.f32.mrb[17].mxu1 }
 0x24b   : > { %v1914_v11 = vadd.f32 %v3466_v23, %v1913_v35  ;;  %v2396_v60 = vpop.f32.mrb[18].mxu1 }
 0x24c   : > { %v2058_v33 = vadd.f32 %v2263_v44, %v1922_v57  ;;  %v1925_v18 = vadd.f32 %v2396_v60, %v3466_v23  ;;  %v1916_v39 = vpop.f32.mrb[19].mxu1 }
 0x24d   : > { %v2056_v48 = vadd.f32 %v2259_v14, %v1914_v11  ;;  %v1917_v4 = vadd.f32 %v3466_v23, %v1916_v39 }
 0x24e   : > { %2090 = vst.msk [vmem:[%s3473_s10 + $0x90] sm:$0xff] %vm400_vm1, %v2058_v33  ;;  %v2059_v45 = vadd.f32 %v2264_v32, %v1925_v18 }
 0x24f   : > { %2088 = vst.msk [vmem:[%s3473_s10 + $0x80] sm:$0xff] %vm400_vm1, %v2056_v48  ;;  %v2057_v36 = vadd.f32 %v2260_v34, %v1917_v4 }
 0x250   : > { %2091 = vst.msk [vmem:[%s3473_s10 + $0x98] sm:$0xff] %vm400_vm1, %v2059_v45 }
 0x251   : > { %2089 = vst.msk [vmem:[%s3473_s10 + $0x88] sm:$0xff] %vm400_vm1, %v2057_v36 }
 0x25d   : > { %v2399_v0 = vpop.f32.mrb[20].mxu1 }
 0x25e   : > { %v1938_v38 = vadd.f32 %v2399_v0, %v3466_v23  ;;  %v1929_v55 = vpop.f32.mrb[21].mxu1 }
 0x25f   : > { %v1930_v63 = vadd.f32 %v3466_v23, %v1929_v55  ;;  %v2400_v13 = vpop.f32.mrb[22].mxu1 }
 0x260   : > { %v2062_v53 = vadd.f32 %v2271_v22, %v1938_v38  ;;  %v1941_v1 = vadd.f32 %v2400_v13, %v3466_v23  ;;  %v1932_v8 = vpop.f32.mrb[23].mxu1 }
 0x261   : > { %v2060_v24 = vadd.f32 %v2267_v15, %v1930_v63  ;;  %v1933_v16 = vadd.f32 %v3466_v23, %v1932_v8 }
 0x262   : > { %2094 = vst.msk [vmem:[%s3473_s10 + $0xb0] sm:$0xff] %vm400_vm1, %v2062_v53  ;;  %v2063_v12 = vadd.f32 %v2272_v3, %v1941_v1 }
 0x263   : > { %2092 = vst.msk [vmem:[%s3473_s10 + $0xa0] sm:$0xff] %vm400_vm1, %v2060_v24  ;;  %v2061_v37 = vadd.f32 %v2268_v27, %v1933_v16 }
 0x264   : > { %2095 = vst.msk [vmem:[%s3473_s10 + $0xb8] sm:$0xff] %vm400_vm1, %v2063_v12 }
 0x265   : > { %2093 = vst.msk [vmem:[%s3473_s10 + $0xa8] sm:$0xff] %vm400_vm1, %v2061_v37 }
 0x272   : > { %v2403_v20 = vpop.f32.mrb[24].mxu1 }
 0x273   : > { %v1954_v51 = vadd.f32 %v2403_v20, %v3466_v23  ;;  %v1945_v9 = vpop.f32.mrb[25].mxu1 }
 0x274   : > { %v1946_v19 = vadd.f32 %v3466_v23, %v1945_v9  ;;  %v2404_v40 = vpop.f32.mrb[26].mxu1 }
 0x275   : > { %v2066_v21 = vadd.f32 %v2279_v28, %v1954_v51  ;;  %v1957_v52 = vadd.f32 %v2404_v40, %v3466_v23  ;;  %v1948_v43 = vpop.f32.mrb[27].mxu1 }
 0x276   : > { %v2064_v17 = vadd.f32 %v2275_v25, %v1946_v19  ;;  %v1949_v31 = vadd.f32 %v3466_v23, %v1948_v43 }
 0x277   : > { %2098 = vst.msk [vmem:[%s3473_s10 + $0xd0] sm:$0xff] %vm400_vm1, %v2066_v21  ;;  %v2067_v46 = vadd.f32 %v2280_v54, %v1957_v52 }
 0x278   : > { %2096 = vst.msk [vmem:[%s3473_s10 + $0xc0] sm:$0xff] %vm400_vm1, %v2064_v17  ;;  %v2065_v59 = vadd.f32 %v2276_v10, %v1949_v31 }
 0x279   : > { %2099 = vst.msk [vmem:[%s3473_s10 + $0xd8] sm:$0xff] %vm400_vm1, %v2067_v46 }
 0x27a   : > { %2097 = vst.msk [vmem:[%s3473_s10 + $0xc8] sm:$0xff] %vm400_vm1, %v2065_v59 }
 0x286   : > { %v2407_v49 = vpop.f32.mrb[28].mxu1 }
 0x287   : > { %v1970_v26 = vadd.f32 %v2407_v49, %v3466_v23  ;;  %v1961_v2 = vpop.f32.mrb[29].mxu1 }
 0x288   : > { %v1962_v30 = vadd.f32 %v3466_v23, %v1961_v2  ;;  %v2408_v50 = vpop.f32.mrb[30].mxu1 }
 0x289   : > { %v2070_v44 = vadd.f32 %v2287_v62, %v1970_v26  ;;  %v1973_v58 = vadd.f32 %v2408_v50, %v3466_v23  ;;  %v1964_v14 = vpop.f32.mrb[31].mxu1 }
 0x28a   : > { %v2068_v57 = vadd.f32 %v2283_v29, %v1962_v30  ;;  %v1965_v35 = vadd.f32 %v3466_v23, %v1964_v14 }
 0x28b   : > { %2102 = vst.msk [vmem:[%s3473_s10 + $0xf0] sm:$0xff] %vm400_vm1, %v2070_v44  ;;  %v2071_v32 = vadd.f32 %v2288_v41, %v1973_v58 }
 0x28c   : > { %2100 = vst.msk [vmem:[%s3473_s10 + $0xe0] sm:$0xff] %vm400_vm1, %v2068_v57  ;;  %v2069_v11 = vadd.f32 %v2284_v5, %v1965_v35 }
 0x28d   : > { %2103 = vst.msk [vmem:[%s3473_s10 + $0xf8] sm:$0xff] %vm400_vm1, %v2071_v32 }
 0x28e   : > { %2101 = vst.msk [vmem:[%s3473_s10 + $0xe8] sm:$0xff] %vm400_vm1, %v2069_v11 }
 0x28f PF: > { %s17_s24 = sadd.s32 1, %s2445_s24  }
 0x290   : > { %p14_p4 = scmp.ge.s32.totalorder %s17_s24, 4  }
 0x292   :  { %16 = sbr.rel (!%p14_p4) target bundleno = 1 (0x1), region = 81 }

</bundles_post_ra>
